<compile_context>
chip_gen: v7x
topology: tpu7x:2x2x1
jax: 0.10.0
libtpu: 0.0.40
codegen_flags: <defaults>
</compile_context>

<pallas_src>
import functools
import math

import jax
import jax.numpy as jnp
from jax.experimental import pallas as pl
from jax.experimental.pallas import tpu as pltpu


# Memory-space handle for "whole array resident in VMEM" parameter specs.
try:
    _VMEM_SPACE = pltpu.MemorySpace.VMEM
except AttributeError:                      # older JAX spelling
    _VMEM_SPACE = pltpu.TPUMemorySpace.VMEM


def _vmem_limit_bytes():
    """~3/4 of per-core VMEM (v7x: 48 MiB, v5e/v6e: 96 MiB), capped at 100 MiB."""
    cap = None
    try:
        cap = getattr(pltpu.get_tpu_info(), "vmem_capacity_bytes", None)
    except Exception:
        cap = None
    if not cap:
        cap = 128 * 1024 * 1024
    return int(min(cap * 3 // 4, 100 * 1024 * 1024))


# ----------------------------------------------------------------------------- kernel

def _decoder_layer_kernel(tgtq_ref, tgt_ref, mem_ref,
                          sa_wq_ref, sa_bq_ref, sa_wkv_ref, sa_bkv_ref,
                          sa_wo_ref, sa_bo_ref, ln1g_ref, ln1b_ref,
                          ca_wq_ref, ca_bq_ref, ca_wkv_ref, ca_bkv_ref,
                          ca_wo_ref, ca_bo_ref, ln2g_ref, ln2b_ref,
                          w1_ref, b1_ref, w2_ref, b2_ref,
                          ln3g_ref, ln3b_ref,
                          out_ref, *, num_heads):
    """One decoder layer for one (batch, query-tile) grid point.

    tgtq_ref: (1, TQ, D) f32  query rows + residual stream for this tile
    tgt_ref : (1, St, D) f32  full tgt (self-attention K/V source)
    mem_ref : (1, Sm, D) bf16 full memory (cross-attention K/V source)
    """
    f32, bf16 = jnp.float32, jnp.bfloat16
    _, _, D = tgtq_ref.shape
    H = num_heads
    dh = D // H
    nt_dims = (((1,), (1,)), ((), ()))      # contract last dims: (m,k)x(n,k)->(m,n)

    xq = tgtq_ref[0]                        # (TQ, D) f32 residual stream
    xq16 = xq.astype(bf16)
    xf16 = tgt_ref[0].astype(bf16)          # (St, D) bf16
    m16 = mem_ref[0]                        # (Sm, D) bf16 (streamed as bf16)

    def layer_norm(h, g_ref, b_ref):        # f32 LayerNorm, eps = 1e-5 (PyTorch)
        mu = jnp.mean(h, axis=-1, keepdims=True)
        var = jnp.mean(jnp.square(h - mu), axis=-1, keepdims=True)
        return (h - mu) * jax.lax.rsqrt(var + 1e-5) * g_ref[...] + b_ref[...]

    def attend(q16, k16, v16, wo_ref, bo_ref):
        """Multi-head attention + output projection.

        q16: (TQ, D) bf16 (1/sqrt(dh) already folded into the Q projection),
        k16, v16: (Skv, D) bf16.  Per-head contexts are scaled by the softmax
        denominator (folded post-PV) and concatenated so the output projection is
        a single full-K (TQ, D) @ (D, D) GEMM."""
        ctxs = []
        for h in range(H):                  # static unroll, H is small
            lo = h * dh
            s = jax.lax.dot_general(q16[:, lo:lo + dh], k16[:, lo:lo + dh],
                                    nt_dims, preferred_element_type=f32)  # (TQ, Skv)
            s = s - jnp.max(s, axis=-1, keepdims=True)
            p = jnp.exp(s)                                                # f32 EUP
            denom = jnp.sum(p, axis=-1, keepdims=True)
            ctx = jnp.dot(p.astype(bf16), v16[:, lo:lo + dh],
                          preferred_element_type=f32)                     # (TQ, dh)
            ctx = ctx * pl.reciprocal(denom, approx=True)                 # fold 1/sum
            ctxs.append(ctx.astype(bf16))
        ctx_all = jnp.concatenate(ctxs, axis=-1)                          # (TQ, D) bf16
        return jnp.dot(ctx_all, wo_ref[...],
                       preferred_element_type=f32) + bo_ref[...]          # (TQ, D) f32

    # ---- self-attention (Q from tile, fused K|V from full tgt) + LN1 ----
    q = (jnp.dot(xq16, sa_wq_ref[...], preferred_element_type=f32)
         + sa_bq_ref[...]).astype(bf16)
    kv = (jnp.dot(xf16, sa_wkv_ref[...], preferred_element_type=f32)
          + sa_bkv_ref[...]).astype(bf16)
    attn = attend(q, kv[:, :D], kv[:, D:], sa_wo_ref, sa_bo_ref)
    h1 = layer_norm(xq + attn, ln1g_ref, ln1b_ref)

    # ---- cross-attention over memory (fused K|V) + LN2 ----
    qc = (jnp.dot(h1.astype(bf16), ca_wq_ref[...], preferred_element_type=f32)
          + ca_bq_ref[...]).astype(bf16)
    kvc = (jnp.dot(m16, ca_wkv_ref[...], preferred_element_type=f32)
           + ca_bkv_ref[...]).astype(bf16)
    attn_c = attend(qc, kvc[:, :D], kvc[:, D:], ca_wo_ref, ca_bo_ref)
    h2 = layer_norm(h1 + attn_c, ln2g_ref, ln2b_ref)

    # ---- feed-forward (Linear -> ReLU -> Linear) + LN3 ----
    f = jnp.dot(h2.astype(bf16), w1_ref[...], preferred_element_type=f32) + b1_ref[...]
    f = jnp.maximum(f, 0.0).astype(bf16)
    f = jnp.dot(f, w2_ref[...], preferred_element_type=f32) + b2_ref[...]
    out_ref[0] = layer_norm(h2 + f, ln3g_ref, ln3b_ref)
    # Dropout layers of the PyTorch module are identity in eval mode (p = 0 here).


# --------------------------------------------------------------------------- wrapper

_PARAM_ORDER = ("sa_wq", "sa_bq", "sa_wkv", "sa_bkv", "sa_wo", "sa_bo",
                "ln1g", "ln1b",
                "ca_wq", "ca_bq", "ca_wkv", "ca_bkv", "ca_wo", "ca_bo",
                "ln2g", "ln2b",
                "w1", "b1", "w2", "b2", "ln3g", "ln3b")


def pack_layer_params(p, num_heads):
    """Fuse & cast raw f32 parameters into the kernel's packed form.

    - self-attn / cross-attn K|V fused to (D, 2D); Q kept separate (query tiling).
    - 1/sqrt(dh) folded into the Q projection weight & bias.
    - weight matrices cast to bf16 (MXU-native, half the VMEM); biases / LN stay f32.
    """
    D = p["sa_wq"].shape[0]
    scale = 1.0 / math.sqrt(D // num_heads)
    bf16 = jnp.bfloat16
    row = lambda v: v.reshape(1, -1).astype(jnp.float32)
    return {
        "sa_wq": (p["sa_wq"] * scale).astype(bf16), "sa_bq": row(p["sa_bq"] * scale),
        "sa_wkv": jnp.concatenate([p["sa_wk"], p["sa_wv"]], axis=1).astype(bf16),
        "sa_bkv": row(jnp.concatenate([p["sa_bk"], p["sa_bv"]])),
        "sa_wo": p["sa_wo"].astype(bf16), "sa_bo": row(p["sa_bo"]),
        "ln1g": row(p["ln1g"]), "ln1b": row(p["ln1b"]),
        "ca_wq": (p["ca_wq"] * scale).astype(bf16), "ca_bq": row(p["ca_bq"] * scale),
        "ca_wkv": jnp.concatenate([p["ca_wk"], p["ca_wv"]], axis=1).astype(bf16),
        "ca_bkv": row(jnp.concatenate([p["ca_bk"], p["ca_bv"]])),
        "ca_wo": p["ca_wo"].astype(bf16), "ca_bo": row(p["ca_bo"]),
        "ln2g": row(p["ln2g"]), "ln2b": row(p["ln2b"]),
        "w1": p["w1"].astype(bf16), "b1": row(p["b1"]),
        "w2": p["w2"].astype(bf16), "b2": row(p["b2"]),
        "ln3g": row(p["ln3g"]), "ln3b": row(p["ln3b"]),
    }


def decoder_layer_pallas(tgt, memory, packed, num_heads, *, tq=None):
    """tgt: (B, St, D) f32, memory: (B, Sm, D) f32 -> (B, St, D) f32."""
    B, St, D = tgt.shape
    Bm, Sm, Dm = memory.shape
    assert Bm == B and Dm == D

    # Query-tile size: 128 when it divides St (and respects the (8,128) sublane
    # rule), otherwise process the full sequence per grid step.
    if tq is None:
        tq = 128 if (St % 128 == 0) else St
    if St % tq != 0 or (tq != St and tq % 8 != 0):
        tq = St
    n_qt = St // tq

    mem_bf16 = memory.astype(jnp.bfloat16)          # stream memory as bf16
    vals = [packed[name] for name in _PARAM_ORDER]
    param_specs = [pl.BlockSpec(memory_space=_VMEM_SPACE) for _ in vals]  # resident

    kernel = functools.partial(_decoder_layer_kernel, num_heads=num_heads)
    return pl.pallas_call(
        kernel,
        out_shape=jax.ShapeDtypeStruct((B, St, D), jnp.float32),
        grid_spec=pltpu.PrefetchScalarGridSpec(
            num_scalar_prefetch=0,
            grid=(B, n_qt),
            in_specs=[pl.BlockSpec((1, tq, D), lambda b, q: (b, q, 0)),   # query tile
                      pl.BlockSpec((1, St, D), lambda b, q: (b, 0, 0)),   # full tgt (K/V)
                      pl.BlockSpec((1, Sm, D), lambda b, q: (b, 0, 0))]   # memory (bf16)
                     + param_specs,
            out_specs=pl.BlockSpec((1, tq, D), lambda b, q: (b, q, 0)),
        ),
        compiler_params=pltpu.CompilerParams(
            dimension_semantics=("parallel", "parallel"),   # megacore shards B and q-tiles
            vmem_limit_bytes=_vmem_limit_bytes(),           # chip-aware VMEM budget
        ),
    )(tgt, tgt, mem_bf16, *vals)


# --------------------------------------------------------------- reference & parameters

def _mha_ref(q_in, k_in, v_in, wq, bq, wk, bk, wv, bv, wo, bo, num_heads):
    B, Sq, D = q_in.shape
    Skv = k_in.shape[1]
    H, dh = num_heads, D // num_heads
    q = (q_in @ wq + bq).reshape(B, Sq, H, dh).transpose(0, 2, 1, 3)
    k = (k_in @ wk + bk).reshape(B, Skv, H, dh).transpose(0, 2, 1, 3)
    v = (v_in @ wv + bv).reshape(B, Skv, H, dh).transpose(0, 2, 1, 3)
    s = jnp.einsum("bhqd,bhkd->bhqk", q, k) / math.sqrt(dh)
    p = jax.nn.softmax(s, axis=-1)
    ctx = jnp.einsum("bhqk,bhkd->bhqd", p, v).transpose(0, 2, 1, 3).reshape(B, Sq, D)
    return ctx @ wo + bo


def _layer_norm_ref(x, g, b, eps=1e-5):
    mu = jnp.mean(x, axis=-1, keepdims=True)
    var = jnp.mean((x - mu) ** 2, axis=-1, keepdims=True)
    return (x - mu) / jnp.sqrt(var + eps) * g + b


def decoder_layer_ref(tgt, memory, p, num_heads):
    a = _mha_ref(tgt, tgt, tgt, p["sa_wq"], p["sa_bq"], p["sa_wk"], p["sa_bk"],
                 p["sa_wv"], p["sa_bv"], p["sa_wo"], p["sa_bo"], num_heads)
    t = _layer_norm_ref(tgt + a, p["ln1g"], p["ln1b"])
    a = _mha_ref(t, memory, memory, p["ca_wq"], p["ca_bq"], p["ca_wk"], p["ca_bk"],
                 p["ca_wv"], p["ca_bv"], p["ca_wo"], p["ca_bo"], num_heads)
    t = _layer_norm_ref(t + a, p["ln2g"], p["ln2b"])
    f = jnp.maximum(t @ p["w1"] + p["b1"], 0.0) @ p["w2"] + p["b2"]
    return _layer_norm_ref(t + f, p["ln3g"], p["ln3b"])


def init_layer_params(key, d_model, dim_feedforward):
    """PyTorch-style Linear init: U(-1/sqrt(fan_in), 1/sqrt(fan_in)); weights (in,out)."""
    D, F = d_model, dim_feedforward
    ks = jax.random.split(key, 10)

    def linear(k, fan_in, fan_out):
        kw, kb = jax.random.split(k)
        bound = 1.0 / math.sqrt(fan_in)
        w = jax.random.uniform(kw, (fan_in, fan_out), jnp.float32, -bound, bound)
        b = jax.random.uniform(kb, (fan_out,), jnp.float32, -bound, bound)
        return w, b

    p = {}
    p["sa_wq"], p["sa_bq"] = linear(ks[0], D, D)
    p["sa_wk"], p["sa_bk"] = linear(ks[1], D, D)
    p["sa_wv"], p["sa_bv"] = linear(ks[2], D, D)
    p["sa_wo"], p["sa_bo"] = linear(ks[3], D, D)
    p["ca_wq"], p["ca_bq"] = linear(ks[4], D, D)
    p["ca_wk"], p["ca_bk"] = linear(ks[5], D, D)
    p["ca_wv"], p["ca_bv"] = linear(ks[6], D, D)
    p["ca_wo"], p["ca_bo"] = linear(ks[7], D, D)
    p["w1"], p["b1"] = linear(ks[8], D, F)
    p["w2"], p["b2"] = linear(ks[9], F, D)
    for name in ("ln1", "ln2", "ln3"):
        p[name + "g"] = jnp.ones((D,), jnp.float32)
        p[name + "b"] = jnp.zeros((D,), jnp.float32)
    return p


# ------------------------------------------------------------------------------- main

if __name__ == "__main__":
    d_model, num_heads, dim_feedforward = 32, 4, 64
    batch, tgt_len, mem_len = 2, 8, 16

    root = jax.random.PRNGKey(0)
    k_params, k_tgt, k_mem = jax.random.split(root, 3)
    params = init_layer_params(k_params, d_model, dim_feedforward)
    tgt = jax.random.normal(k_tgt, (batch, tgt_len, d_model), jnp.float32)
    memory = jax.random.normal(k_mem, (batch, mem_len, d_model), jnp.float32)

    packed = pack_layer_params(params, num_heads)
    out = decoder_layer_pallas(tgt, memory, packed, num_heads)
    out = jax.block_until_ready(out)

    assert out.shape == (batch, tgt_len, d_model) and out.dtype == jnp.float32

    ref = decoder_layer_ref(tgt, memory, params, num_heads)
    err = float(jnp.max(jnp.abs(out - ref)))
    assert err < 5e-2, f"max abs error vs f32 reference too large: {err}"

    # TODO(synk): no tgt_mask / key-padding-mask support — the source PyTorch module
    # defines none; add masking if the deployment needs causal decoding.
    print("KERNEL_OK")
</pallas_src>

<mosaic_0001>
module attributes {stable_mosaic.version = 11 : i64} {
  func.func @_decoder_layer_kernel(%arg0: i32, %arg1: i32, %arg2: memref<1x8x32xf32, #tpu.memory_space<vmem>>, %arg3: memref<1x8x32xf32, #tpu.memory_space<vmem>>, %arg4: memref<1x16x32xbf16, #tpu.memory_space<vmem>>, %arg5: memref<32x32xbf16, #tpu.memory_space<vmem>>, %arg6: memref<1x32xf32, #tpu.memory_space<vmem>>, %arg7: memref<32x64xbf16, #tpu.memory_space<vmem>>, %arg8: memref<1x64xf32, #tpu.memory_space<vmem>>, %arg9: memref<32x32xbf16, #tpu.memory_space<vmem>>, %arg10: memref<1x32xf32, #tpu.memory_space<vmem>>, %arg11: memref<1x32xf32, #tpu.memory_space<vmem>>, %arg12: memref<1x32xf32, #tpu.memory_space<vmem>>, %arg13: memref<32x32xbf16, #tpu.memory_space<vmem>>, %arg14: memref<1x32xf32, #tpu.memory_space<vmem>>, %arg15: memref<32x64xbf16, #tpu.memory_space<vmem>>, %arg16: memref<1x64xf32, #tpu.memory_space<vmem>>, %arg17: memref<32x32xbf16, #tpu.memory_space<vmem>>, %arg18: memref<1x32xf32, #tpu.memory_space<vmem>>, %arg19: memref<1x32xf32, #tpu.memory_space<vmem>>, %arg20: memref<1x32xf32, #tpu.memory_space<vmem>>, %arg21: memref<32x64xbf16, #tpu.memory_space<vmem>>, %arg22: memref<1x64xf32, #tpu.memory_space<vmem>>, %arg23: memref<64x32xbf16, #tpu.memory_space<vmem>>, %arg24: memref<1x32xf32, #tpu.memory_space<vmem>>, %arg25: memref<1x32xf32, #tpu.memory_space<vmem>>, %arg26: memref<1x32xf32, #tpu.memory_space<vmem>>, %arg27: memref<1x8x32xf32, #tpu.memory_space<vmem>>) attributes {dimension_semantics = [#tpu.dimension_semantics<parallel>, #tpu.dimension_semantics<parallel>], iteration_bounds = array<i64: 2, 1>, scalar_prefetch = 0 : i64, scratch_operands = 0 : i64, tpu.core_type = #tpu.core_type<tc>, window_params = [{transform_indices = @transform_0, window_bounds = array<i64: 1, 8, 32>}, {transform_indices = @transform_1, window_bounds = array<i64: 1, 8, 32>}, {transform_indices = @transform_2, window_bounds = array<i64: 1, 16, 32>}, {pipeline_mode = #tpu.pipeline_mode<synchronous>, transform_indices = @transform_3, window_bounds = array<i64: 32, 32>}, {pipeline_mode = #tpu.pipeline_mode<synchronous>, transform_indices = @transform_4, window_bounds = array<i64: 1, 32>}, {pipeline_mode = #tpu.pipeline_mode<synchronous>, transform_indices = @transform_5, window_bounds = array<i64: 32, 64>}, {pipeline_mode = #tpu.pipeline_mode<synchronous>, transform_indices = @transform_6, window_bounds = array<i64: 1, 64>}, {pipeline_mode = #tpu.pipeline_mode<synchronous>, transform_indices = @transform_7, window_bounds = array<i64: 32, 32>}, {pipeline_mode = #tpu.pipeline_mode<synchronous>, transform_indices = @transform_8, window_bounds = array<i64: 1, 32>}, {pipeline_mode = #tpu.pipeline_mode<synchronous>, transform_indices = @transform_9, window_bounds = array<i64: 1, 32>}, {pipeline_mode = #tpu.pipeline_mode<synchronous>, transform_indices = @transform_10, window_bounds = array<i64: 1, 32>}, {pipeline_mode = #tpu.pipeline_mode<synchronous>, transform_indices = @transform_11, window_bounds = array<i64: 32, 32>}, {pipeline_mode = #tpu.pipeline_mode<synchronous>, transform_indices = @transform_12, window_bounds = array<i64: 1, 32>}, {pipeline_mode = #tpu.pipeline_mode<synchronous>, transform_indices = @transform_13, window_bounds = array<i64: 32, 64>}, {pipeline_mode = #tpu.pipeline_mode<synchronous>, transform_indices = @transform_14, window_bounds = array<i64: 1, 64>}, {pipeline_mode = #tpu.pipeline_mode<synchronous>, transform_indices = @transform_15, window_bounds = array<i64: 32, 32>}, {pipeline_mode = #tpu.pipeline_mode<synchronous>, transform_indices = @transform_16, window_bounds = array<i64: 1, 32>}, {pipeline_mode = #tpu.pipeline_mode<synchronous>, transform_indices = @transform_17, window_bounds = array<i64: 1, 32>}, {pipeline_mode = #tpu.pipeline_mode<synchronous>, transform_indices = @transform_18, window_bounds = array<i64: 1, 32>}, {pipeline_mode = #tpu.pipeline_mode<synchronous>, transform_indices = @transform_19, window_bounds = array<i64: 32, 64>}, {pipeline_mode = #tpu.pipeline_mode<synchronous>, transform_indices = @transform_20, window_bounds = array<i64: 1, 64>}, {pipeline_mode = #tpu.pipeline_mode<synchronous>, transform_indices = @transform_21, window_bounds = array<i64: 64, 32>}, {pipeline_mode = #tpu.pipeline_mode<synchronous>, transform_indices = @transform_22, window_bounds = array<i64: 1, 32>}, {pipeline_mode = #tpu.pipeline_mode<synchronous>, transform_indices = @transform_23, window_bounds = array<i64: 1, 32>}, {pipeline_mode = #tpu.pipeline_mode<synchronous>, transform_indices = @transform_24, window_bounds = array<i64: 1, 32>}, {transform_indices = @transform_25, window_bounds = array<i64: 1, 8, 32>}]} {
    %c0 = arith.constant 0 : index
    %c0_0 = arith.constant 0 : index
    %c0_1 = arith.constant 0 : index
    %0 = vector.load %arg2[%c0, %c0_0, %c0_1] : memref<1x8x32xf32, #tpu.memory_space<vmem>>, vector<1x8x32xf32>
    %1 = vector.shape_cast %0 : vector<1x8x32xf32> to vector<8x32xf32>
    %2 = arith.truncf %1 : vector<8x32xf32> to vector<8x32xbf16>
    %c0_2 = arith.constant 0 : index
    %c0_3 = arith.constant 0 : index
    %c0_4 = arith.constant 0 : index
    %3 = vector.load %arg3[%c0_2, %c0_3, %c0_4] : memref<1x8x32xf32, #tpu.memory_space<vmem>>, vector<1x8x32xf32>
    %4 = vector.shape_cast %3 : vector<1x8x32xf32> to vector<8x32xf32>
    %5 = arith.truncf %4 : vector<8x32xf32> to vector<8x32xbf16>
    %c0_5 = arith.constant 0 : index
    %c0_6 = arith.constant 0 : index
    %c0_7 = arith.constant 0 : index
    %6 = vector.load %arg4[%c0_5, %c0_6, %c0_7] : memref<1x16x32xbf16, #tpu.memory_space<vmem>>, vector<1x16x32xbf16>
    %7 = vector.shape_cast %6 : vector<1x16x32xbf16> to vector<16x32xbf16>
    %c0_8 = arith.constant 0 : index
    %c0_9 = arith.constant 0 : index
    %8 = vector.load %arg5[%c0_8, %c0_9] : memref<32x32xbf16, #tpu.memory_space<vmem>>, vector<32x32xbf16>
    %cst = arith.constant dense<0.000000e+00> : vector<8x32xf32>
    %9 = tpu.matmul %2, %8, %cst {dimension_numbers = #tpu.dot_dimension_numbers<[1], [0], [0], [1], [0, 0, 1, 1], [], []>} : vector<8x32xbf16>, vector<32x32xbf16>, vector<8x32xf32> -> vector<8x32xf32>
    %c0_10 = arith.constant 0 : index
    %c0_11 = arith.constant 0 : index
    %10 = vector.load %arg6[%c0_10, %c0_11] : memref<1x32xf32, #tpu.memory_space<vmem>>, vector<1x32xf32>
    %11 = vector.broadcast %10 : vector<1x32xf32> to vector<8x32xf32>
    %12 = arith.addf %9, %11 : vector<8x32xf32>
    %13 = arith.truncf %12 : vector<8x32xf32> to vector<8x32xbf16>
    %c0_12 = arith.constant 0 : index
    %c0_13 = arith.constant 0 : index
    %14 = vector.load %arg7[%c0_12, %c0_13] : memref<32x64xbf16, #tpu.memory_space<vmem>>, vector<32x64xbf16>
    %cst_14 = arith.constant dense<0.000000e+00> : vector<8x64xf32>
    %15 = tpu.matmul %5, %14, %cst_14 {dimension_numbers = #tpu.dot_dimension_numbers<[1], [0], [0], [1], [0, 0, 1, 1], [], []>} : vector<8x32xbf16>, vector<32x64xbf16>, vector<8x64xf32> -> vector<8x64xf32>
    %c0_15 = arith.constant 0 : index
    %c0_16 = arith.constant 0 : index
    %16 = vector.load %arg8[%c0_15, %c0_16] : memref<1x64xf32, #tpu.memory_space<vmem>>, vector<1x64xf32>
    %17 = vector.broadcast %16 : vector<1x64xf32> to vector<8x64xf32>
    %18 = arith.addf %15, %17 : vector<8x64xf32>
    %19 = arith.truncf %18 : vector<8x64xf32> to vector<8x64xbf16>
    %20 = vector.extract_strided_slice %19 {offsets = [0, 0], sizes = [8, 32], strides = [1, 1]} : vector<8x64xbf16> to vector<8x32xbf16>
    %21 = vector.extract_strided_slice %19 {offsets = [0, 32], sizes = [8, 32], strides = [1, 1]} : vector<8x64xbf16> to vector<8x32xbf16>
    %22 = vector.extract_strided_slice %13 {offsets = [0, 0], sizes = [8, 8], strides = [1, 1]} : vector<8x32xbf16> to vector<8x8xbf16>
    %23 = vector.extract_strided_slice %20 {offsets = [0, 0], sizes = [8, 8], strides = [1, 1]} : vector<8x32xbf16> to vector<8x8xbf16>
    %cst_17 = arith.constant dense<0.000000e+00> : vector<8x8xf32>
    %24 = tpu.matmul %22, %23, %cst_17 {dimension_numbers = #tpu.dot_dimension_numbers<[1], [1], [0], [0], [0, 0, 1, 0], [], []>} : vector<8x8xbf16>, vector<8x8xbf16>, vector<8x8xf32> -> vector<8x8xf32>
    %cst_18 = arith.constant dense<0xFF800000> : vector<8xf32>
    %25 = vector.multi_reduction <maximumf>, %24, %cst_18 [1] : vector<8x8xf32> to vector<8xf32>
    %26 = vector.shape_cast %25 : vector<8xf32> to vector<8x1xf32>
    %27 = vector.broadcast %26 : vector<8x1xf32> to vector<8x8xf32>
    %28 = arith.subf %24, %27 : vector<8x8xf32>
    %29 = math.exp %28 : vector<8x8xf32>
    %cst_19 = arith.constant dense<0.000000e+00> : vector<8xf32>
    %30 = vector.multi_reduction <add>, %29, %cst_19 [1] : vector<8x8xf32> to vector<8xf32>
    %31 = vector.shape_cast %30 : vector<8xf32> to vector<8x1xf32>
    %32 = arith.truncf %29 : vector<8x8xf32> to vector<8x8xbf16>
    %33 = vector.extract_strided_slice %21 {offsets = [0, 0], sizes = [8, 8], strides = [1, 1]} : vector<8x32xbf16> to vector<8x8xbf16>
    %cst_20 = arith.constant dense<0.000000e+00> : vector<8x8xf32>
    %34 = tpu.matmul %32, %33, %cst_20 {dimension_numbers = #tpu.dot_dimension_numbers<[1], [0], [0], [1], [0, 0, 1, 1], [], []>} : vector<8x8xbf16>, vector<8x8xbf16>, vector<8x8xf32> -> vector<8x8xf32>
    %35 = tpu.reciprocal %31 {approx = true} : vector<8x1xf32> -> vector<8x1xf32>
    %36 = vector.broadcast %35 : vector<8x1xf32> to vector<8x8xf32>
    %37 = arith.mulf %34, %36 : vector<8x8xf32>
    %38 = arith.truncf %37 : vector<8x8xf32> to vector<8x8xbf16>
    %39 = vector.extract_strided_slice %13 {offsets = [0, 8], sizes = [8, 8], strides = [1, 1]} : vector<8x32xbf16> to vector<8x8xbf16>
    %40 = vector.extract_strided_slice %20 {offsets = [0, 8], sizes = [8, 8], strides = [1, 1]} : vector<8x32xbf16> to vector<8x8xbf16>
    %cst_21 = arith.constant dense<0.000000e+00> : vector<8x8xf32>
    %41 = tpu.matmul %39, %40, %cst_21 {dimension_numbers = #tpu.dot_dimension_numbers<[1], [1], [0], [0], [0, 0, 1, 0], [], []>} : vector<8x8xbf16>, vector<8x8xbf16>, vector<8x8xf32> -> vector<8x8xf32>
    %cst_22 = arith.constant dense<0xFF800000> : vector<8xf32>
    %42 = vector.multi_reduction <maximumf>, %41, %cst_22 [1] : vector<8x8xf32> to vector<8xf32>
    %43 = vector.shape_cast %42 : vector<8xf32> to vector<8x1xf32>
    %44 = vector.broadcast %43 : vector<8x1xf32> to vector<8x8xf32>
    %45 = arith.subf %41, %44 : vector<8x8xf32>
    %46 = math.exp %45 : vector<8x8xf32>
    %cst_23 = arith.constant dense<0.000000e+00> : vector<8xf32>
    %47 = vector.multi_reduction <add>, %46, %cst_23 [1] : vector<8x8xf32> to vector<8xf32>
    %48 = vector.shape_cast %47 : vector<8xf32> to vector<8x1xf32>
    %49 = arith.truncf %46 : vector<8x8xf32> to vector<8x8xbf16>
    %50 = vector.extract_strided_slice %21 {offsets = [0, 8], sizes = [8, 8], strides = [1, 1]} : vector<8x32xbf16> to vector<8x8xbf16>
    %cst_24 = arith.constant dense<0.000000e+00> : vector<8x8xf32>
    %51 = tpu.matmul %49, %50, %cst_24 {dimension_numbers = #tpu.dot_dimension_numbers<[1], [0], [0], [1], [0, 0, 1, 1], [], []>} : vector<8x8xbf16>, vector<8x8xbf16>, vector<8x8xf32> -> vector<8x8xf32>
    %52 = tpu.reciprocal %48 {approx = true} : vector<8x1xf32> -> vector<8x1xf32>
    %53 = vector.broadcast %52 : vector<8x1xf32> to vector<8x8xf32>
    %54 = arith.mulf %51, %53 : vector<8x8xf32>
    %55 = arith.truncf %54 : vector<8x8xf32> to vector<8x8xbf16>
    %56 = vector.extract_strided_slice %13 {offsets = [0, 16], sizes = [8, 8], strides = [1, 1]} : vector<8x32xbf16> to vector<8x8xbf16>
    %57 = vector.extract_strided_slice %20 {offsets = [0, 16], sizes = [8, 8], strides = [1, 1]} : vector<8x32xbf16> to vector<8x8xbf16>
    %cst_25 = arith.constant dense<0.000000e+00> : vector<8x8xf32>
    %58 = tpu.matmul %56, %57, %cst_25 {dimension_numbers = #tpu.dot_dimension_numbers<[1], [1], [0], [0], [0, 0, 1, 0], [], []>} : vector<8x8xbf16>, vector<8x8xbf16>, vector<8x8xf32> -> vector<8x8xf32>
    %cst_26 = arith.constant dense<0xFF800000> : vector<8xf32>
    %59 = vector.multi_reduction <maximumf>, %58, %cst_26 [1] : vector<8x8xf32> to vector<8xf32>
    %60 = vector.shape_cast %59 : vector<8xf32> to vector<8x1xf32>
    %61 = vector.broadcast %60 : vector<8x1xf32> to vector<8x8xf32>
    %62 = arith.subf %58, %61 : vector<8x8xf32>
    %63 = math.exp %62 : vector<8x8xf32>
    %cst_27 = arith.constant dense<0.000000e+00> : vector<8xf32>
    %64 = vector.multi_reduction <add>, %63, %cst_27 [1] : vector<8x8xf32> to vector<8xf32>
    %65 = vector.shape_cast %64 : vector<8xf32> to vector<8x1xf32>
    %66 = arith.truncf %63 : vector<8x8xf32> to vector<8x8xbf16>
    %67 = vector.extract_strided_slice %21 {offsets = [0, 16], sizes = [8, 8], strides = [1, 1]} : vector<8x32xbf16> to vector<8x8xbf16>
    %cst_28 = arith.constant dense<0.000000e+00> : vector<8x8xf32>
    %68 = tpu.matmul %66, %67, %cst_28 {dimension_numbers = #tpu.dot_dimension_numbers<[1], [0], [0], [1], [0, 0, 1, 1], [], []>} : vector<8x8xbf16>, vector<8x8xbf16>, vector<8x8xf32> -> vector<8x8xf32>
    %69 = tpu.reciprocal %65 {approx = true} : vector<8x1xf32> -> vector<8x1xf32>
    %70 = vector.broadcast %69 : vector<8x1xf32> to vector<8x8xf32>
    %71 = arith.mulf %68, %70 : vector<8x8xf32>
    %72 = arith.truncf %71 : vector<8x8xf32> to vector<8x8xbf16>
    %73 = vector.extract_strided_slice %13 {offsets = [0, 24], sizes = [8, 8], strides = [1, 1]} : vector<8x32xbf16> to vector<8x8xbf16>
    %74 = vector.extract_strided_slice %20 {offsets = [0, 24], sizes = [8, 8], strides = [1, 1]} : vector<8x32xbf16> to vector<8x8xbf16>
    %cst_29 = arith.constant dense<0.000000e+00> : vector<8x8xf32>
    %75 = tpu.matmul %73, %74, %cst_29 {dimension_numbers = #tpu.dot_dimension_numbers<[1], [1], [0], [0], [0, 0, 1, 0], [], []>} : vector<8x8xbf16>, vector<8x8xbf16>, vector<8x8xf32> -> vector<8x8xf32>
    %cst_30 = arith.constant dense<0xFF800000> : vector<8xf32>
    %76 = vector.multi_reduction <maximumf>, %75, %cst_30 [1] : vector<8x8xf32> to vector<8xf32>
    %77 = vector.shape_cast %76 : vector<8xf32> to vector<8x1xf32>
    %78 = vector.broadcast %77 : vector<8x1xf32> to vector<8x8xf32>
    %79 = arith.subf %75, %78 : vector<8x8xf32>
    %80 = math.exp %79 : vector<8x8xf32>
    %cst_31 = arith.constant dense<0.000000e+00> : vector<8xf32>
    %81 = vector.multi_reduction <add>, %80, %cst_31 [1] : vector<8x8xf32> to vector<8xf32>
    %82 = vector.shape_cast %81 : vector<8xf32> to vector<8x1xf32>
    %83 = arith.truncf %80 : vector<8x8xf32> to vector<8x8xbf16>
    %84 = vector.extract_strided_slice %21 {offsets = [0, 24], sizes = [8, 8], strides = [1, 1]} : vector<8x32xbf16> to vector<8x8xbf16>
    %cst_32 = arith.constant dense<0.000000e+00> : vector<8x8xf32>
    %85 = tpu.matmul %83, %84, %cst_32 {dimension_numbers = #tpu.dot_dimension_numbers<[1], [0], [0], [1], [0, 0, 1, 1], [], []>} : vector<8x8xbf16>, vector<8x8xbf16>, vector<8x8xf32> -> vector<8x8xf32>
    %86 = tpu.reciprocal %82 {approx = true} : vector<8x1xf32> -> vector<8x1xf32>
    %87 = vector.broadcast %86 : vector<8x1xf32> to vector<8x8xf32>
    %88 = arith.mulf %85, %87 : vector<8x8xf32>
    %89 = arith.truncf %88 : vector<8x8xf32> to vector<8x8xbf16>
    %90 = tpu.concatenate %38, %55, %72, %89 in 1 : vector<8x8xbf16>, vector<8x8xbf16>, vector<8x8xbf16>, vector<8x8xbf16> -> vector<8x32xbf16>
    %c0_33 = arith.constant 0 : index
    %c0_34 = arith.constant 0 : index
    %91 = vector.load %arg9[%c0_33, %c0_34] : memref<32x32xbf16, #tpu.memory_space<vmem>>, vector<32x32xbf16>
    %cst_35 = arith.constant dense<0.000000e+00> : vector<8x32xf32>
    %92 = tpu.matmul %90, %91, %cst_35 {dimension_numbers = #tpu.dot_dimension_numbers<[1], [0], [0], [1], [0, 0, 1, 1], [], []>} : vector<8x32xbf16>, vector<32x32xbf16>, vector<8x32xf32> -> vector<8x32xf32>
    %c0_36 = arith.constant 0 : index
    %c0_37 = arith.constant 0 : index
    %93 = vector.load %arg10[%c0_36, %c0_37] : memref<1x32xf32, #tpu.memory_space<vmem>>, vector<1x32xf32>
    %94 = vector.broadcast %93 : vector<1x32xf32> to vector<8x32xf32>
    %95 = arith.addf %92, %94 : vector<8x32xf32>
    %96 = arith.addf %1, %95 : vector<8x32xf32>
    %cst_38 = arith.constant dense<0.000000e+00> : vector<8xf32>
    %97 = vector.multi_reduction <add>, %96, %cst_38 [1] : vector<8x32xf32> to vector<8xf32>
    %98 = vector.shape_cast %97 : vector<8xf32> to vector<8x1xf32>
    %cst_39 = arith.constant 3.200000e+01 : f32
    %99 = vector.broadcast %cst_39 : f32 to vector<8x1xf32>
    %100 = arith.divf %98, %99 : vector<8x1xf32>
    %101 = vector.broadcast %100 : vector<8x1xf32> to vector<8x32xf32>
    %102 = arith.subf %96, %101 : vector<8x32xf32>
    %103 = arith.mulf %102, %102 : vector<8x32xf32>
    %cst_40 = arith.constant dense<0.000000e+00> : vector<8xf32>
    %104 = vector.multi_reduction <add>, %103, %cst_40 [1] : vector<8x32xf32> to vector<8xf32>
    %105 = vector.shape_cast %104 : vector<8xf32> to vector<8x1xf32>
    %cst_41 = arith.constant 3.200000e+01 : f32
    %106 = vector.broadcast %cst_41 : f32 to vector<8x1xf32>
    %107 = arith.divf %105, %106 : vector<8x1xf32>
    %108 = vector.broadcast %100 : vector<8x1xf32> to vector<8x32xf32>
    %109 = arith.subf %96, %108 : vector<8x32xf32>
    %cst_42 = arith.constant 9.99999974E-6 : f32
    %110 = vector.broadcast %cst_42 : f32 to vector<8x1xf32>
    %111 = arith.addf %107, %110 : vector<8x1xf32>
    %112 = math.rsqrt %111 : vector<8x1xf32>
    %113 = vector.broadcast %112 : vector<8x1xf32> to vector<8x32xf32>
    %114 = arith.mulf %109, %113 : vector<8x32xf32>
    %c0_43 = arith.constant 0 : index
    %c0_44 = arith.constant 0 : index
    %115 = vector.load %arg11[%c0_43, %c0_44] : memref<1x32xf32, #tpu.memory_space<vmem>>, vector<1x32xf32>
    %116 = vector.broadcast %115 : vector<1x32xf32> to vector<8x32xf32>
    %117 = arith.mulf %114, %116 : vector<8x32xf32>
    %c0_45 = arith.constant 0 : index
    %c0_46 = arith.constant 0 : index
    %118 = vector.load %arg12[%c0_45, %c0_46] : memref<1x32xf32, #tpu.memory_space<vmem>>, vector<1x32xf32>
    %119 = vector.broadcast %118 : vector<1x32xf32> to vector<8x32xf32>
    %120 = arith.addf %117, %119 : vector<8x32xf32>
    %121 = arith.truncf %120 : vector<8x32xf32> to vector<8x32xbf16>
    %c0_47 = arith.constant 0 : index
    %c0_48 = arith.constant 0 : index
    %122 = vector.load %arg13[%c0_47, %c0_48] : memref<32x32xbf16, #tpu.memory_space<vmem>>, vector<32x32xbf16>
    %cst_49 = arith.constant dense<0.000000e+00> : vector<8x32xf32>
    %123 = tpu.matmul %121, %122, %cst_49 {dimension_numbers = #tpu.dot_dimension_numbers<[1], [0], [0], [1], [0, 0, 1, 1], [], []>} : vector<8x32xbf16>, vector<32x32xbf16>, vector<8x32xf32> -> vector<8x32xf32>
    %c0_50 = arith.constant 0 : index
    %c0_51 = arith.constant 0 : index
    %124 = vector.load %arg14[%c0_50, %c0_51] : memref<1x32xf32, #tpu.memory_space<vmem>>, vector<1x32xf32>
    %125 = vector.broadcast %124 : vector<1x32xf32> to vector<8x32xf32>
    %126 = arith.addf %123, %125 : vector<8x32xf32>
    %127 = arith.truncf %126 : vector<8x32xf32> to vector<8x32xbf16>
    %c0_52 = arith.constant 0 : index
    %c0_53 = arith.constant 0 : index
    %128 = vector.load %arg15[%c0_52, %c0_53] : memref<32x64xbf16, #tpu.memory_space<vmem>>, vector<32x64xbf16>
    %cst_54 = arith.constant dense<0.000000e+00> : vector<16x64xf32>
    %129 = tpu.matmul %7, %128, %cst_54 {dimension_numbers = #tpu.dot_dimension_numbers<[1], [0], [0], [1], [0, 0, 1, 1], [], []>} : vector<16x32xbf16>, vector<32x64xbf16>, vector<16x64xf32> -> vector<16x64xf32>
    %c0_55 = arith.constant 0 : index
    %c0_56 = arith.constant 0 : index
    %130 = vector.load %arg16[%c0_55, %c0_56] : memref<1x64xf32, #tpu.memory_space<vmem>>, vector<1x64xf32>
    %131 = vector.broadcast %130 : vector<1x64xf32> to vector<16x64xf32>
    %132 = arith.addf %129, %131 : vector<16x64xf32>
    %133 = arith.truncf %132 : vector<16x64xf32> to vector<16x64xbf16>
    %134 = vector.extract_strided_slice %133 {offsets = [0, 0], sizes = [16, 32], strides = [1, 1]} : vector<16x64xbf16> to vector<16x32xbf16>
    %135 = vector.extract_strided_slice %133 {offsets = [0, 32], sizes = [16, 32], strides = [1, 1]} : vector<16x64xbf16> to vector<16x32xbf16>
    %136 = vector.extract_strided_slice %127 {offsets = [0, 0], sizes = [8, 8], strides = [1, 1]} : vector<8x32xbf16> to vector<8x8xbf16>
    %137 = vector.extract_strided_slice %134 {offsets = [0, 0], sizes = [16, 8], strides = [1, 1]} : vector<16x32xbf16> to vector<16x8xbf16>
    %cst_57 = arith.constant dense<0.000000e+00> : vector<8x16xf32>
    %138 = tpu.matmul %136, %137, %cst_57 {dimension_numbers = #tpu.dot_dimension_numbers<[1], [1], [0], [0], [0, 0, 1, 0], [], []>} : vector<8x8xbf16>, vector<16x8xbf16>, vector<8x16xf32> -> vector<8x16xf32>
    %cst_58 = arith.constant dense<0xFF800000> : vector<8xf32>
    %139 = vector.multi_reduction <maximumf>, %138, %cst_58 [1] : vector<8x16xf32> to vector<8xf32>
    %140 = vector.shape_cast %139 : vector<8xf32> to vector<8x1xf32>
    %141 = vector.broadcast %140 : vector<8x1xf32> to vector<8x16xf32>
    %142 = arith.subf %138, %141 : vector<8x16xf32>
    %143 = math.exp %142 : vector<8x16xf32>
    %cst_59 = arith.constant dense<0.000000e+00> : vector<8xf32>
    %144 = vector.multi_reduction <add>, %143, %cst_59 [1] : vector<8x16xf32> to vector<8xf32>
    %145 = vector.shape_cast %144 : vector<8xf32> to vector<8x1xf32>
    %146 = arith.truncf %143 : vector<8x16xf32> to vector<8x16xbf16>
    %147 = vector.extract_strided_slice %135 {offsets = [0, 0], sizes = [16, 8], strides = [1, 1]} : vector<16x32xbf16> to vector<16x8xbf16>
    %cst_60 = arith.constant dense<0.000000e+00> : vector<8x8xf32>
    %148 = tpu.matmul %146, %147, %cst_60 {dimension_numbers = #tpu.dot_dimension_numbers<[1], [0], [0], [1], [0, 0, 1, 1], [], []>} : vector<8x16xbf16>, vector<16x8xbf16>, vector<8x8xf32> -> vector<8x8xf32>
    %149 = tpu.reciprocal %145 {approx = true} : vector<8x1xf32> -> vector<8x1xf32>
    %150 = vector.broadcast %149 : vector<8x1xf32> to vector<8x8xf32>
    %151 = arith.mulf %148, %150 : vector<8x8xf32>
    %152 = arith.truncf %151 : vector<8x8xf32> to vector<8x8xbf16>
    %153 = vector.extract_strided_slice %127 {offsets = [0, 8], sizes = [8, 8], strides = [1, 1]} : vector<8x32xbf16> to vector<8x8xbf16>
    %154 = vector.extract_strided_slice %134 {offsets = [0, 8], sizes = [16, 8], strides = [1, 1]} : vector<16x32xbf16> to vector<16x8xbf16>
    %cst_61 = arith.constant dense<0.000000e+00> : vector<8x16xf32>
    %155 = tpu.matmul %153, %154, %cst_61 {dimension_numbers = #tpu.dot_dimension_numbers<[1], [1], [0], [0], [0, 0, 1, 0], [], []>} : vector<8x8xbf16>, vector<16x8xbf16>, vector<8x16xf32> -> vector<8x16xf32>
    %cst_62 = arith.constant dense<0xFF800000> : vector<8xf32>
    %156 = vector.multi_reduction <maximumf>, %155, %cst_62 [1] : vector<8x16xf32> to vector<8xf32>
    %157 = vector.shape_cast %156 : vector<8xf32> to vector<8x1xf32>
    %158 = vector.broadcast %157 : vector<8x1xf32> to vector<8x16xf32>
    %159 = arith.subf %155, %158 : vector<8x16xf32>
    %160 = math.exp %159 : vector<8x16xf32>
    %cst_63 = arith.constant dense<0.000000e+00> : vector<8xf32>
    %161 = vector.multi_reduction <add>, %160, %cst_63 [1] : vector<8x16xf32> to vector<8xf32>
    %162 = vector.shape_cast %161 : vector<8xf32> to vector<8x1xf32>
    %163 = arith.truncf %160 : vector<8x16xf32> to vector<8x16xbf16>
    %164 = vector.extract_strided_slice %135 {offsets = [0, 8], sizes = [16, 8], strides = [1, 1]} : vector<16x32xbf16> to vector<16x8xbf16>
    %cst_64 = arith.constant dense<0.000000e+00> : vector<8x8xf32>
    %165 = tpu.matmul %163, %164, %cst_64 {dimension_numbers = #tpu.dot_dimension_numbers<[1], [0], [0], [1], [0, 0, 1, 1], [], []>} : vector<8x16xbf16>, vector<16x8xbf16>, vector<8x8xf32> -> vector<8x8xf32>
    %166 = tpu.reciprocal %162 {approx = true} : vector<8x1xf32> -> vector<8x1xf32>
    %167 = vector.broadcast %166 : vector<8x1xf32> to vector<8x8xf32>
    %168 = arith.mulf %165, %167 : vector<8x8xf32>
    %169 = arith.truncf %168 : vector<8x8xf32> to vector<8x8xbf16>
    %170 = vector.extract_strided_slice %127 {offsets = [0, 16], sizes = [8, 8], strides = [1, 1]} : vector<8x32xbf16> to vector<8x8xbf16>
    %171 = vector.extract_strided_slice %134 {offsets = [0, 16], sizes = [16, 8], strides = [1, 1]} : vector<16x32xbf16> to vector<16x8xbf16>
    %cst_65 = arith.constant dense<0.000000e+00> : vector<8x16xf32>
    %172 = tpu.matmul %170, %171, %cst_65 {dimension_numbers = #tpu.dot_dimension_numbers<[1], [1], [0], [0], [0, 0, 1, 0], [], []>} : vector<8x8xbf16>, vector<16x8xbf16>, vector<8x16xf32> -> vector<8x16xf32>
    %cst_66 = arith.constant dense<0xFF800000> : vector<8xf32>
    %173 = vector.multi_reduction <maximumf>, %172, %cst_66 [1] : vector<8x16xf32> to vector<8xf32>
    %174 = vector.shape_cast %173 : vector<8xf32> to vector<8x1xf32>
    %175 = vector.broadcast %174 : vector<8x1xf32> to vector<8x16xf32>
    %176 = arith.subf %172, %175 : vector<8x16xf32>
    %177 = math.exp %176 : vector<8x16xf32>
    %cst_67 = arith.constant dense<0.000000e+00> : vector<8xf32>
    %178 = vector.multi_reduction <add>, %177, %cst_67 [1] : vector<8x16xf32> to vector<8xf32>
    %179 = vector.shape_cast %178 : vector<8xf32> to vector<8x1xf32>
    %180 = arith.truncf %177 : vector<8x16xf32> to vector<8x16xbf16>
    %181 = vector.extract_strided_slice %135 {offsets = [0, 16], sizes = [16, 8], strides = [1, 1]} : vector<16x32xbf16> to vector<16x8xbf16>
    %cst_68 = arith.constant dense<0.000000e+00> : vector<8x8xf32>
    %182 = tpu.matmul %180, %181, %cst_68 {dimension_numbers = #tpu.dot_dimension_numbers<[1], [0], [0], [1], [0, 0, 1, 1], [], []>} : vector<8x16xbf16>, vector<16x8xbf16>, vector<8x8xf32> -> vector<8x8xf32>
    %183 = tpu.reciprocal %179 {approx = true} : vector<8x1xf32> -> vector<8x1xf32>
    %184 = vector.broadcast %183 : vector<8x1xf32> to vector<8x8xf32>
    %185 = arith.mulf %182, %184 : vector<8x8xf32>
    %186 = arith.truncf %185 : vector<8x8xf32> to vector<8x8xbf16>
    %187 = vector.extract_strided_slice %127 {offsets = [0, 24], sizes = [8, 8], strides = [1, 1]} : vector<8x32xbf16> to vector<8x8xbf16>
    %188 = vector.extract_strided_slice %134 {offsets = [0, 24], sizes = [16, 8], strides = [1, 1]} : vector<16x32xbf16> to vector<16x8xbf16>
    %cst_69 = arith.constant dense<0.000000e+00> : vector<8x16xf32>
    %189 = tpu.matmul %187, %188, %cst_69 {dimension_numbers = #tpu.dot_dimension_numbers<[1], [1], [0], [0], [0, 0, 1, 0], [], []>} : vector<8x8xbf16>, vector<16x8xbf16>, vector<8x16xf32> -> vector<8x16xf32>
    %cst_70 = arith.constant dense<0xFF800000> : vector<8xf32>
    %190 = vector.multi_reduction <maximumf>, %189, %cst_70 [1] : vector<8x16xf32> to vector<8xf32>
    %191 = vector.shape_cast %190 : vector<8xf32> to vector<8x1xf32>
    %192 = vector.broadcast %191 : vector<8x1xf32> to vector<8x16xf32>
    %193 = arith.subf %189, %192 : vector<8x16xf32>
    %194 = math.exp %193 : vector<8x16xf32>
    %cst_71 = arith.constant dense<0.000000e+00> : vector<8xf32>
    %195 = vector.multi_reduction <add>, %194, %cst_71 [1] : vector<8x16xf32> to vector<8xf32>
    %196 = vector.shape_cast %195 : vector<8xf32> to vector<8x1xf32>
    %197 = arith.truncf %194 : vector<8x16xf32> to vector<8x16xbf16>
    %198 = vector.extract_strided_slice %135 {offsets = [0, 24], sizes = [16, 8], strides = [1, 1]} : vector<16x32xbf16> to vector<16x8xbf16>
    %cst_72 = arith.constant dense<0.000000e+00> : vector<8x8xf32>
    %199 = tpu.matmul %197, %198, %cst_72 {dimension_numbers = #tpu.dot_dimension_numbers<[1], [0], [0], [1], [0, 0, 1, 1], [], []>} : vector<8x16xbf16>, vector<16x8xbf16>, vector<8x8xf32> -> vector<8x8xf32>
    %200 = tpu.reciprocal %196 {approx = true} : vector<8x1xf32> -> vector<8x1xf32>
    %201 = vector.broadcast %200 : vector<8x1xf32> to vector<8x8xf32>
    %202 = arith.mulf %199, %201 : vector<8x8xf32>
    %203 = arith.truncf %202 : vector<8x8xf32> to vector<8x8xbf16>
    %204 = tpu.concatenate %152, %169, %186, %203 in 1 : vector<8x8xbf16>, vector<8x8xbf16>, vector<8x8xbf16>, vector<8x8xbf16> -> vector<8x32xbf16>
    %c0_73 = arith.constant 0 : index
    %c0_74 = arith.constant 0 : index
    %205 = vector.load %arg17[%c0_73, %c0_74] : memref<32x32xbf16, #tpu.memory_space<vmem>>, vector<32x32xbf16>
    %cst_75 = arith.constant dense<0.000000e+00> : vector<8x32xf32>
    %206 = tpu.matmul %204, %205, %cst_75 {dimension_numbers = #tpu.dot_dimension_numbers<[1], [0], [0], [1], [0, 0, 1, 1], [], []>} : vector<8x32xbf16>, vector<32x32xbf16>, vector<8x32xf32> -> vector<8x32xf32>
    %c0_76 = arith.constant 0 : index
    %c0_77 = arith.constant 0 : index
    %207 = vector.load %arg18[%c0_76, %c0_77] : memref<1x32xf32, #tpu.memory_space<vmem>>, vector<1x32xf32>
    %208 = vector.broadcast %207 : vector<1x32xf32> to vector<8x32xf32>
    %209 = arith.addf %206, %208 : vector<8x32xf32>
    %210 = arith.addf %120, %209 : vector<8x32xf32>
    %cst_78 = arith.constant dense<0.000000e+00> : vector<8xf32>
    %211 = vector.multi_reduction <add>, %210, %cst_78 [1] : vector<8x32xf32> to vector<8xf32>
    %212 = vector.shape_cast %211 : vector<8xf32> to vector<8x1xf32>
    %cst_79 = arith.constant 3.200000e+01 : f32
    %213 = vector.broadcast %cst_79 : f32 to vector<8x1xf32>
    %214 = arith.divf %212, %213 : vector<8x1xf32>
    %215 = vector.broadcast %214 : vector<8x1xf32> to vector<8x32xf32>
    %216 = arith.subf %210, %215 : vector<8x32xf32>
    %217 = arith.mulf %216, %216 : vector<8x32xf32>
    %cst_80 = arith.constant dense<0.000000e+00> : vector<8xf32>
    %218 = vector.multi_reduction <add>, %217, %cst_80 [1] : vector<8x32xf32> to vector<8xf32>
    %219 = vector.shape_cast %218 : vector<8xf32> to vector<8x1xf32>
    %cst_81 = arith.constant 3.200000e+01 : f32
    %220 = vector.broadcast %cst_81 : f32 to vector<8x1xf32>
    %221 = arith.divf %219, %220 : vector<8x1xf32>
    %222 = vector.broadcast %214 : vector<8x1xf32> to vector<8x32xf32>
    %223 = arith.subf %210, %222 : vector<8x32xf32>
    %cst_82 = arith.constant 9.99999974E-6 : f32
    %224 = vector.broadcast %cst_82 : f32 to vector<8x1xf32>
    %225 = arith.addf %221, %224 : vector<8x1xf32>
    %226 = math.rsqrt %225 : vector<8x1xf32>
    %227 = vector.broadcast %226 : vector<8x1xf32> to vector<8x32xf32>
    %228 = arith.mulf %223, %227 : vector<8x32xf32>
    %c0_83 = arith.constant 0 : index
    %c0_84 = arith.constant 0 : index
    %229 = vector.load %arg19[%c0_83, %c0_84] : memref<1x32xf32, #tpu.memory_space<vmem>>, vector<1x32xf32>
    %230 = vector.broadcast %229 : vector<1x32xf32> to vector<8x32xf32>
    %231 = arith.mulf %228, %230 : vector<8x32xf32>
    %c0_85 = arith.constant 0 : index
    %c0_86 = arith.constant 0 : index
    %232 = vector.load %arg20[%c0_85, %c0_86] : memref<1x32xf32, #tpu.memory_space<vmem>>, vector<1x32xf32>
    %233 = vector.broadcast %232 : vector<1x32xf32> to vector<8x32xf32>
    %234 = arith.addf %231, %233 : vector<8x32xf32>
    %235 = arith.truncf %234 : vector<8x32xf32> to vector<8x32xbf16>
    %c0_87 = arith.constant 0 : index
    %c0_88 = arith.constant 0 : index
    %236 = vector.load %arg21[%c0_87, %c0_88] : memref<32x64xbf16, #tpu.memory_space<vmem>>, vector<32x64xbf16>
    %cst_89 = arith.constant dense<0.000000e+00> : vector<8x64xf32>
    %237 = tpu.matmul %235, %236, %cst_89 {dimension_numbers = #tpu.dot_dimension_numbers<[1], [0], [0], [1], [0, 0, 1, 1], [], []>} : vector<8x32xbf16>, vector<32x64xbf16>, vector<8x64xf32> -> vector<8x64xf32>
    %c0_90 = arith.constant 0 : index
    %c0_91 = arith.constant 0 : index
    %238 = vector.load %arg22[%c0_90, %c0_91] : memref<1x64xf32, #tpu.memory_space<vmem>>, vector<1x64xf32>
    %239 = vector.broadcast %238 : vector<1x64xf32> to vector<8x64xf32>
    %240 = arith.addf %237, %239 : vector<8x64xf32>
    %cst_92 = arith.constant 0.000000e+00 : f32
    %241 = vector.broadcast %cst_92 : f32 to vector<8x64xf32>
    %242 = arith.maximumf %240, %241 : vector<8x64xf32>
    %243 = arith.truncf %242 : vector<8x64xf32> to vector<8x64xbf16>
    %c0_93 = arith.constant 0 : index
    %c0_94 = arith.constant 0 : index
    %244 = vector.load %arg23[%c0_93, %c0_94] : memref<64x32xbf16, #tpu.memory_space<vmem>>, vector<64x32xbf16>
    %cst_95 = arith.constant dense<0.000000e+00> : vector<8x32xf32>
    %245 = tpu.matmul %243, %244, %cst_95 {dimension_numbers = #tpu.dot_dimension_numbers<[1], [0], [0], [1], [0, 0, 1, 1], [], []>} : vector<8x64xbf16>, vector<64x32xbf16>, vector<8x32xf32> -> vector<8x32xf32>
    %c0_96 = arith.constant 0 : index
    %c0_97 = arith.constant 0 : index
    %246 = vector.load %arg24[%c0_96, %c0_97] : memref<1x32xf32, #tpu.memory_space<vmem>>, vector<1x32xf32>
    %247 = vector.broadcast %246 : vector<1x32xf32> to vector<8x32xf32>
    %248 = arith.addf %245, %247 : vector<8x32xf32>
    %249 = arith.addf %234, %248 : vector<8x32xf32>
    %cst_98 = arith.constant dense<0.000000e+00> : vector<8xf32>
    %250 = vector.multi_reduction <add>, %249, %cst_98 [1] : vector<8x32xf32> to vector<8xf32>
    %251 = vector.shape_cast %250 : vector<8xf32> to vector<8x1xf32>
    %cst_99 = arith.constant 3.200000e+01 : f32
    %252 = vector.broadcast %cst_99 : f32 to vector<8x1xf32>
    %253 = arith.divf %251, %252 : vector<8x1xf32>
    %254 = vector.broadcast %253 : vector<8x1xf32> to vector<8x32xf32>
    %255 = arith.subf %249, %254 : vector<8x32xf32>
    %256 = arith.mulf %255, %255 : vector<8x32xf32>
    %cst_100 = arith.constant dense<0.000000e+00> : vector<8xf32>
    %257 = vector.multi_reduction <add>, %256, %cst_100 [1] : vector<8x32xf32> to vector<8xf32>
    %258 = vector.shape_cast %257 : vector<8xf32> to vector<8x1xf32>
    %cst_101 = arith.constant 3.200000e+01 : f32
    %259 = vector.broadcast %cst_101 : f32 to vector<8x1xf32>
    %260 = arith.divf %258, %259 : vector<8x1xf32>
    %261 = vector.broadcast %253 : vector<8x1xf32> to vector<8x32xf32>
    %262 = arith.subf %249, %261 : vector<8x32xf32>
    %cst_102 = arith.constant 9.99999974E-6 : f32
    %263 = vector.broadcast %cst_102 : f32 to vector<8x1xf32>
    %264 = arith.addf %260, %263 : vector<8x1xf32>
    %265 = math.rsqrt %264 : vector<8x1xf32>
    %266 = vector.broadcast %265 : vector<8x1xf32> to vector<8x32xf32>
    %267 = arith.mulf %262, %266 : vector<8x32xf32>
    %c0_103 = arith.constant 0 : index
    %c0_104 = arith.constant 0 : index
    %268 = vector.load %arg25[%c0_103, %c0_104] : memref<1x32xf32, #tpu.memory_space<vmem>>, vector<1x32xf32>
    %269 = vector.broadcast %268 : vector<1x32xf32> to vector<8x32xf32>
    %270 = arith.mulf %267, %269 : vector<8x32xf32>
    %c0_105 = arith.constant 0 : index
    %c0_106 = arith.constant 0 : index
    %271 = vector.load %arg26[%c0_105, %c0_106] : memref<1x32xf32, #tpu.memory_space<vmem>>, vector<1x32xf32>
    %272 = vector.broadcast %271 : vector<1x32xf32> to vector<8x32xf32>
    %273 = arith.addf %270, %272 : vector<8x32xf32>
    %c0_107 = arith.constant 0 : index
    %c0_108 = arith.constant 0 : index
    %c0_109 = arith.constant 0 : index
    %274 = vector.load %arg27[%c0_107, %c0_108, %c0_109] : memref<1x8x32xf32, #tpu.memory_space<vmem>>, vector<1x8x32xf32>
    %275 = vector.shape_cast %274 : vector<1x8x32xf32> to vector<8x32xf32>
    %276 = vector.shape_cast %273 : vector<8x32xf32> to vector<1x8x32xf32>
    tpu.vector_store %arg27[%c0_107, %c0_108, %c0_109], %276 {strides = array<i32>} : memref<1x8x32xf32, #tpu.memory_space<vmem>>, vector<1x8x32xf32>,
    return
  }
  func.func @transform_0(%arg0: i32, %arg1: i32) -> (i32, i32, i32) {
    %c0_i32 = arith.constant 0 : i32
    %c0_i32_0 = arith.constant 0 : i32
    return %arg0, %arg1, %c0_i32 : i32, i32, i32
  }
  func.func @transform_1(%arg0: i32, %arg1: i32) -> (i32, i32, i32) {
    %c0_i32 = arith.constant 0 : i32
    %c0_i32_0 = arith.constant 0 : i32
    %c0_i32_1 = arith.constant 0 : i32
    return %arg0, %c0_i32, %c0_i32_0 : i32, i32, i32
  }
  func.func @transform_2(%arg0: i32, %arg1: i32) -> (i32, i32, i32) {
    %c0_i32 = arith.constant 0 : i32
    %c0_i32_0 = arith.constant 0 : i32
    %c0_i32_1 = arith.constant 0 : i32
    return %arg0, %c0_i32, %c0_i32_0 : i32, i32, i32
  }
  func.func @transform_3(%arg0: i32, %arg1: i32) -> (i32, i32) {
    %c0_i32 = arith.constant 0 : i32
    %c0_i32_0 = arith.constant 0 : i32
    %c0_i32_1 = arith.constant 0 : i32
    return %c0_i32, %c0_i32_0 : i32, i32
  }
  func.func @transform_4(%arg0: i32, %arg1: i32) -> (i32, i32) {
    %c0_i32 = arith.constant 0 : i32
    %c0_i32_0 = arith.constant 0 : i32
    %c0_i32_1 = arith.constant 0 : i32
    return %c0_i32, %c0_i32_0 : i32, i32
  }
  func.func @transform_5(%arg0: i32, %arg1: i32) -> (i32, i32) {
    %c0_i32 = arith.constant 0 : i32
    %c0_i32_0 = arith.constant 0 : i32
    %c0_i32_1 = arith.constant 0 : i32
    return %c0_i32, %c0_i32_0 : i32, i32
  }
  func.func @transform_6(%arg0: i32, %arg1: i32) -> (i32, i32) {
    %c0_i32 = arith.constant 0 : i32
    %c0_i32_0 = arith.constant 0 : i32
    %c0_i32_1 = arith.constant 0 : i32
    return %c0_i32, %c0_i32_0 : i32, i32
  }
  func.func @transform_7(%arg0: i32, %arg1: i32) -> (i32, i32) {
    %c0_i32 = arith.constant 0 : i32
    %c0_i32_0 = arith.constant 0 : i32
    %c0_i32_1 = arith.constant 0 : i32
    return %c0_i32, %c0_i32_0 : i32, i32
  }
  func.func @transform_8(%arg0: i32, %arg1: i32) -> (i32, i32) {
    %c0_i32 = arith.constant 0 : i32
    %c0_i32_0 = arith.constant 0 : i32
    %c0_i32_1 = arith.constant 0 : i32
    return %c0_i32, %c0_i32_0 : i32, i32
  }
  func.func @transform_9(%arg0: i32, %arg1: i32) -> (i32, i32) {
    %c0_i32 = arith.constant 0 : i32
    %c0_i32_0 = arith.constant 0 : i32
    %c0_i32_1 = arith.constant 0 : i32
    return %c0_i32, %c0_i32_0 : i32, i32
  }
  func.func @transform_10(%arg0: i32, %arg1: i32) -> (i32, i32) {
    %c0_i32 = arith.constant 0 : i32
    %c0_i32_0 = arith.constant 0 : i32
    %c0_i32_1 = arith.constant 0 : i32
    return %c0_i32, %c0_i32_0 : i32, i32
  }
  func.func @transform_11(%arg0: i32, %arg1: i32) -> (i32, i32) {
    %c0_i32 = arith.constant 0 : i32
    %c0_i32_0 = arith.constant 0 : i32
    %c0_i32_1 = arith.constant 0 : i32
    return %c0_i32, %c0_i32_0 : i32, i32
  }
  func.func @transform_12(%arg0: i32, %arg1: i32) -> (i32, i32) {
    %c0_i32 = arith.constant 0 : i32
    %c0_i32_0 = arith.constant 0 : i32
    %c0_i32_1 = arith.constant 0 : i32
    return %c0_i32, %c0_i32_0 : i32, i32
  }
  func.func @transform_13(%arg0: i32, %arg1: i32) -> (i32, i32) {
    %c0_i32 = arith.constant 0 : i32
    %c0_i32_0 = arith.constant 0 : i32
    %c0_i32_1 = arith.constant 0 : i32
    return %c0_i32, %c0_i32_0 : i32, i32
  }
  func.func @transform_14(%arg0: i32, %arg1: i32) -> (i32, i32) {
    %c0_i32 = arith.constant 0 : i32
    %c0_i32_0 = arith.constant 0 : i32
    %c0_i32_1 = arith.constant 0 : i32
    return %c0_i32, %c0_i32_0 : i32, i32
  }
  func.func @transform_15(%arg0: i32, %arg1: i32) -> (i32, i32) {
    %c0_i32 = arith.constant 0 : i32
    %c0_i32_0 = arith.constant 0 : i32
    %c0_i32_1 = arith.constant 0 : i32
    return %c0_i32, %c0_i32_0 : i32, i32
  }
  func.func @transform_16(%arg0: i32, %arg1: i32) -> (i32, i32) {
    %c0_i32 = arith.constant 0 : i32
    %c0_i32_0 = arith.constant 0 : i32
    %c0_i32_1 = arith.constant 0 : i32
    return %c0_i32, %c0_i32_0 : i32, i32
  }
  func.func @transform_17(%arg0: i32, %arg1: i32) -> (i32, i32) {
    %c0_i32 = arith.constant 0 : i32
    %c0_i32_0 = arith.constant 0 : i32
    %c0_i32_1 = arith.constant 0 : i32
    return %c0_i32, %c0_i32_0 : i32, i32
  }
  func.func @transform_18(%arg0: i32, %arg1: i32) -> (i32, i32) {
    %c0_i32 = arith.constant 0 : i32
    %c0_i32_0 = arith.constant 0 : i32
    %c0_i32_1 = arith.constant 0 : i32
    return %c0_i32, %c0_i32_0 : i32, i32
  }
  func.func @transform_19(%arg0: i32, %arg1: i32) -> (i32, i32) {
    %c0_i32 = arith.constant 0 : i32
    %c0_i32_0 = arith.constant 0 : i32
    %c0_i32_1 = arith.constant 0 : i32
    return %c0_i32, %c0_i32_0 : i32, i32
  }
  func.func @transform_20(%arg0: i32, %arg1: i32) -> (i32, i32) {
    %c0_i32 = arith.constant 0 : i32
    %c0_i32_0 = arith.constant 0 : i32
    %c0_i32_1 = arith.constant 0 : i32
    return %c0_i32, %c0_i32_0 : i32, i32
  }
  func.func @transform_21(%arg0: i32, %arg1: i32) -> (i32, i32) {
    %c0_i32 = arith.constant 0 : i32
    %c0_i32_0 = arith.constant 0 : i32
    %c0_i32_1 = arith.constant 0 : i32
    return %c0_i32, %c0_i32_0 : i32, i32
  }
  func.func @transform_22(%arg0: i32, %arg1: i32) -> (i32, i32) {
    %c0_i32 = arith.constant 0 : i32
    %c0_i32_0 = arith.constant 0 : i32
    %c0_i32_1 = arith.constant 0 : i32
    return %c0_i32, %c0_i32_0 : i32, i32
  }
  func.func @transform_23(%arg0: i32, %arg1: i32) -> (i32, i32) {
    %c0_i32 = arith.constant 0 : i32
    %c0_i32_0 = arith.constant 0 : i32
    %c0_i32_1 = arith.constant 0 : i32
    return %c0_i32, %c0_i32_0 : i32, i32
  }
  func.func @transform_24(%arg0: i32, %arg1: i32) -> (i32, i32) {
    %c0_i32 = arith.constant 0 : i32
    %c0_i32_0 = arith.constant 0 : i32
    %c0_i32_1 = arith.constant 0 : i32
    return %c0_i32, %c0_i32_0 : i32, i32
  }
  func.func @transform_25(%arg0: i32, %arg1: i32) -> (i32, i32, i32) {
    %c0_i32 = arith.constant 0 : i32
    %c0_i32_0 = arith.constant 0 : i32
    return %arg0, %arg1, %c0_i32 : i32, i32, i32
  }
}

</mosaic_0001>

<bundles_post_ra>
// kernel: tpu_custom_call.1
= control target key start
LH: loop header
LB: loop body
LE: loop exit
PB: predicated region body
PF: predicated region fallthrough
CT: control target
= control target key end

     0   :  { %s5765_s0 = inlined_call_operand.hbm [shape: f32[2,8,32], index: 0, kind: input, shape index: {}]   ;;  %s5766_s1 = inlined_call_operand.hbm [shape: f32[2,8,32], index: 1, kind: input, shape index: {}]   ;;  %s5767_s2 = inlined_call_operand.hbm [shape: bf16[2,16,32], index: 2, kind: input, shape index: {}]   ;;  %s5768_s3 = inlined_call_operand.hbm [shape: bf16[32,32], index: 3, kind: input, shape index: {}]   ;;  %s5769_s4 = inlined_call_operand.hbm [shape: f32[1,32], index: 4, kind: input, shape index: {}]   ;;  %s5770_s5 = inlined_call_operand.hbm [shape: bf16[32,64], index: 5, kind: input, shape index: {}]   ;;  %s5771_s6 = inlined_call_operand.hbm [shape: f32[1,64], index: 6, kind: input, shape index: {}]   ;;  %s5772_s7 = inlined_call_operand.hbm [shape: bf16[32,32], index: 7, kind: input, shape index: {}]   ;;  %s5773_s8 = inlined_call_operand.hbm [shape: f32[1,32], index: 8, kind: input, shape index: {}]   ;;  %s5774_s9 = inlined_call_operand.hbm [shape: f32[1,32], index: 9, kind: input, shape index: {}]   ;;  %s5775_s10 = inlined_call_operand.hbm [shape: f32[1,32], index: 10, kind: input, shape index: {}]   ;;  %s5776_s11 = inlined_call_operand.hbm [shape: bf16[32,32], index: 11, kind: input, shape index: {}]   ;;  %s5777_s12 = inlined_call_operand.hbm [shape: f32[1,32], index: 12, kind: input, shape index: {}]   ;;  %s5778_s13 = inlined_call_operand.hbm [shape: bf16[32,64], index: 13, kind: input, shape index: {}]   ;;  %s5779_s14 = inlined_call_operand.hbm [shape: f32[1,64], index: 14, kind: input, shape index: {}]   ;;  %s5780_s15 = inlined_call_operand.hbm [shape: bf16[32,32], index: 15, kind: input, shape index: {}]   ;;  %s5781_s16 = inlined_call_operand.hbm [shape: f32[1,32], index: 16, kind: input, shape index: {}]   ;;  %s5782_s17 = inlined_call_operand.hbm [shape: f32[1,32], index: 17, kind: input, shape index: {}]   ;;  %s5783_s18 = inlined_call_operand.hbm [shape: f32[1,32], index: 18, kind: input, shape index: {}]   ;;  %s5784_s19 = inlined_call_operand.hbm [shape: bf16[32,64], index: 19, kind: input, shape index: {}]   ;;  %s5785_s20 = inlined_call_operand.hbm [shape: f32[1,64], index: 20, kind: input, shape index: {}]   ;;  %s5786_s21 = inlined_call_operand.hbm [shape: bf16[64,32], index: 21, kind: input, shape index: {}]   ;;  %s5787_s22 = inlined_call_operand.hbm [shape: f32[1,32], index: 22, kind: input, shape index: {}]   ;;  %s5788_s23 = inlined_call_operand.hbm [shape: f32[1,32], index: 23, kind: input, shape index: {}]   ;;  %s5789_s24 = inlined_call_operand.hbm [shape: f32[1,32], index: 24, kind: input, shape index: {}]   ;;  %s5790_s25 = inlined_call_operand.hbm [shape: f32[2,8,32], index: 25, kind: output, shape index: {}]  }
   0x1   :  { %5846 = sst [smem:[#allocation63_spill]] %s5765_s0 }
   0x2   :  { %5847 = sst [smem:[#allocation64_spill]] %s5766_s1 }
   0x3   :  { %5848 = sst [smem:[#allocation65_spill]] %s5767_s2 }
   0x4   :  { %5849 = sst [smem:[#allocation66_spill]] %s5768_s3 }
   0x5   :  { %5850 = sst [smem:[#allocation67_spill]] %s5769_s4 }
   0x6   :  { %5851 = sst [smem:[#allocation68_spill]] %s5770_s5 }
   0x7   :  { %5852 = sst [smem:[#allocation69_spill]] %s5771_s6 }
   0x8   :  { %5853 = sst [smem:[#allocation70_spill]] %s5772_s7 }
   0x9   :  { %5854 = sst [smem:[#allocation71_spill]] %s5773_s8 }
   0xa   :  { %5855 = sst [smem:[#allocation72_spill]] %s5774_s9 }
   0xb   :  { %5856 = sst [smem:[#allocation73_spill]] %s5775_s10 }
   0xc   :  { %5857 = sst [smem:[#allocation74_spill]] %s5776_s11 }
   0xd   :  { %5858 = sst [smem:[#allocation75_spill]] %s5777_s12 }
   0xe   :  { %5859 = sst [smem:[#allocation76_spill]] %s5778_s13 }
   0xf   :  { %5860 = sst [smem:[#allocation77_spill]] %s5779_s14 }
  0x10   :  { %5861 = sst [smem:[#allocation78_spill]] %s5780_s15 }
  0x11   :  { %5862 = sst [smem:[#allocation79_spill]] %s5781_s16 }
  0x12   :  { %5863 = sst [smem:[#allocation80_spill]] %s5782_s17 }
  0x13   :  { %5864 = sst [smem:[#allocation81_spill]] %s5783_s18 }
  0x14   :  { %5865 = sst [smem:[#allocation82_spill]] %s5784_s19 }
  0x15   :  { %5866 = sst [smem:[#allocation83_spill]] %s5785_s20 }
  0x16   :  { %5867 = sst [smem:[#allocation84_spill]] %s5786_s21 }
  0x17   :  { %5868 = sst [smem:[#allocation85_spill]] %s5787_s22 }
  0x18   :  { %5869 = sst [smem:[#allocation86_spill]] %s5788_s23 }
  0x19   :  { %5870 = sst [smem:[#allocation87_spill]] %s5789_s24 }
  0x1a   :  { %5871 = sst [smem:[#allocation88_spill]] %s5790_s25 }
  0x1b   :  { %30 = vsyncpa [#allocation3], 0 }
  0x1c   :  { %32 = vsyncpa [#allocation3 + $0x1], 0 }
  0x1d   :  { %33 = vsyncpa [#allocation6], 0 }
  0x1e   :  { %35 = vsyncpa [#allocation6 + $0x1], 0 }
  0x1f   :  { %36 = vsyncpa [#allocation9], 0 }
  0x20   :  { %37 = vsyncpa [#allocation12], 0 }
  0x21   :  { %38 = vsyncpa [#allocation15], 0 }
  0x22   :  { %39 = vsyncpa [#allocation18], 0 }
  0x23   :  { %40 = vsyncpa [#allocation21], 0 }
  0x24   :  { %41 = vsyncpa [#allocation24], 0 }
  0x25   :  { %42 = vsyncpa [#allocation27], 0 }
  0x26   :  { %43 = vsyncpa [#allocation30], 0 }
  0x27   :  { %44 = vsyncpa [#allocation33], 0 }
  0x28   :  { %45 = vsyncpa [#allocation36], 0 }
  0x29   :  { %46 = vsyncpa [#allocation39], 0 }
  0x2a   :  { %47 = vsyncpa [#allocation4], 0 }
  0x2b   :  { %49 = vsyncpa [#allocation4 + $0x1], 0  ;;  %s4794_s29 = smov 0   ;;  %s4796_s2 = smov 0  }
  0x2c   :  { %s4798_s6 = smov 0   ;;  %s4800_s30 = smov 0  }
  0x2d   :  { %s4802_s7 = smov 0   ;;  %s4804_s3 = smov 0  }
  0x2e LB: > { %5872 = sst [smem:[#allocation56_spill]] %s4614_s30  ;;  %s4825_s26 = sadd.s32 4294967295, %s4622_s3   ;;  %s4622_s3 = sphi %s4804_s3, %s55_s3   ;;  %s4618_s7 = sphi %s4802_s7, %s5958_s7   ;;  %s4614_s30 = sphi %s4800_s30, %s5957_s30   ;;  %s4610_s6 = sphi %s4798_s6, %s5961_s6   ;;  %s4606_s2 = sphi %s4796_s2, %s5960_s2   ;;  %s4602_s29 = sphi %s4794_s29, %s5959_s29  }
  0x2f   : > { %5873 = sst [smem:[#allocation57_spill]] %s4618_s7  ;;  %p3080_p0 = scmp.ge.s32.totalorder %s4622_s3, 1 }
  0x30   : > { %5874 = sst [smem:[#allocation58_spill]] %s4622_s3  ;;  %p5812_p1 = scmp.eq.s32.totalorder %s4825_s26, 0 }
  0x31   : > { %5875 = sst [smem:[#allocation59_spill]] %s4825_s26  ;;  %p642_p2 = scmp.lt.s32.totalorder %s4622_s3, 3 }
  0x32   : > { %s4624_s8 = smov [#allocation8]   ;;  %s4625_s28 = smov [#allocation11]  }
  0x33   : > { %p4830_p3 = pnand %p3080_p0, %p642_p2  ;;  %s654_s27 = sshll.u32 %s4624_s8, 4  ;;  %s4834_s27 = int_to_ptr.vmem [resolvable:$true] %s654_s27 }
  0x34   : > { %s678_s9 = sshll.u32 %s4625_s28, 4  ;;  %s4626_s5 = smov [#allocation14]   ;;  %s4845_s9 = int_to_ptr.vmem [resolvable:$true] %s678_s9 }
  0x35   : > { %s5876_s1 = scalar_select %p4830_p3, 1, 0 }
  0x36   : > { %p3518_p4 = pneg %p4830_p3  ;;  %s4847_s0 = sshll.u32 %s4626_s5, 4  ;;  %s703_s0 = int_to_ptr.vmem [resolvable:$true] %s4847_s0 }
  0x37   : > { %5877 = sst [smem:[#allocation60_spill]] %s5876_s1  ;;  %s5879_s30 = sld [smem:[#allocation66_spill]] }
  0x38   : > { %p4841_p6 = pnand %p3518_p4, %p5812_p1 }
  0x3a   : > { %s5878_s4 = scalar_select %p4841_p6, 1, 0 }
  0x3b   : > { %p4857_p8 = pneg %p4841_p6 }
  0x3d   : > { %s5880_s24 = smov %s5879_s30  ;;  %s3786_s22 = scalar_lea.hbm %s5879_s30, 256 }
  0x3e   : > { %p3787_p7 = scmp.ne.s32.totalorder %s5880_s24, %s3786_s22  ;;  %p3793_p11 = scmp.lt.u32.totalorder %s3786_s22, %s5880_s24 }
  0x3f   : > { %s5881_s18 = scalar_select %p4857_p8, 1, 0 }
  0x40   : > { %p3789_p9 = pnand %p4857_p8, %p3787_p7 }
  0x42   : > { %p3790_p10 = pneg %p3789_p9 }
  0x44   : > { %p3795_p12 = pnand %p3793_p11, %p3790_p10 }
  0x46   : > { %3798 = shalt.err (!%p3795_p12)
}
  0x47   : > { %s3799_s20 = scalar_lea.vmem %s4834_s27, 256  ;;  %p3807_p4 = scmp.lt.s32.totalorder %s4834_s27, %s4834_s27 }
  0x48   : > { %p3800_p13 = scmp.ne.s32.totalorder %s4834_s27, %s3799_s20  ;;  %p3808_p5 = scmp.lt.s32.totalorder %s3799_s20, %s3799_s20 }
  0x4a   : > { %p3802_p0 = pnand %p3800_p13, %p4857_p8  ;;  %p3809_p7 = por %p3808_p5, %p3807_p4 }
  0x4c   : > { %p3803_p2 = pneg %p3802_p0 }
  0x4e   : > { %p3810_p9 = pnand %p3809_p7, %p3803_p2 }
  0x50   : > { %3813 = shalt.err (!%p3810_p9)
}
  0x51   : > { %s5818_s25 = smov 64   ;;  %s5819_s22 = smov 4  }
  0x52   : > { %3521 = dma.hbm_to_vmem [thread:$0]  (!%p4841_p6), %s5880_s24, 256, %s4834_s27, [#allocation9], %s5818_s25, %s5818_s25, %s5819_s22  }
  0x53   : > { %s5882_s5 = sld [smem:[#allocation68_spill]] }
  0x59   : > { %s3814_s20 = scalar_lea.hbm %s5882_s5, 256 }
  0x5a   : > { %p3815_p5 = scmp.ne.s32.totalorder %s5882_s5, %s3814_s20  ;;  %p3821_p12 = scmp.lt.u32.totalorder %s3814_s20, %s5882_s5 }
  0x5c   : > { %p3817_p10 = pnand %p3815_p5, %p4857_p8 }
  0x5e   : > { %p3818_p11 = pneg %p3817_p10 }
  0x60   : > { %p3823_p13 = pnand %p3821_p12, %p3818_p11 }
  0x62   : > { %3826 = shalt.err (!%p3823_p13)
}
  0x63   : > { %s3827_s27 = scalar_lea.vmem %s4845_s9, 256  ;;  %p3835_p7 = scmp.lt.s32.totalorder %s4845_s9, %s4845_s9 }
  0x64   : > { %p3828_p0 = scmp.ne.s32.totalorder %s4845_s9, %s3827_s27  ;;  %p3836_p9 = scmp.lt.s32.totalorder %s3827_s27, %s3827_s27 }
  0x66   : > { %p3830_p2 = pnand %p3828_p0, %p4857_p8  ;;  %p3837_p5 = por %p3836_p9, %p3835_p7 }
  0x68   : > { %p3831_p4 = pneg %p3830_p2 }
  0x6a   : > { %p3838_p10 = pnand %p3837_p5, %p3831_p4 }
  0x6c   : > { %3841 = shalt.err (!%p3838_p10)
}
  0x6d   : > { %3527 = dma.hbm_to_vmem [thread:$0]  (!%p4841_p6), %s5882_s5, 256, %s4845_s9, [#allocation12], %s5818_s25, %s5818_s25, %s5819_s22  }
  0x6e   : > { %s5883_s30 = sld [smem:[#allocation70_spill]] }
  0x74   : > { %s5884_s1 = smov %s5883_s30  ;;  %s3842_s8 = scalar_lea.hbm %s5883_s30, 256 }
  0x75   : > { %p3843_p11 = scmp.ne.s32.totalorder %s5884_s1, %s3842_s8  ;;  %p3849_p0 = scmp.lt.u32.totalorder %s3842_s8, %s5884_s1 }
  0x77   : > { %p3845_p12 = pnand %p3843_p11, %p4857_p8 }
  0x79   : > { %p3846_p13 = pneg %p3845_p12 }
  0x7b   : > { %p3851_p2 = pnand %p3849_p0, %p3846_p13 }
  0x7d   : > { %3854 = shalt.err (!%p3851_p2)
}
  0x7e   : > { %s3855_s10 = scalar_lea.vmem %s703_s0, 256  ;;  %p3863_p5 = scmp.lt.s32.totalorder %s703_s0, %s703_s0 }
  0x7f   : > { %p3856_p4 = scmp.ne.s32.totalorder %s703_s0, %s3855_s10  ;;  %p3864_p10 = scmp.lt.s32.totalorder %s3855_s10, %s3855_s10 }
  0x81   : > { %p3858_p7 = pnand %p3856_p4, %p4857_p8  ;;  %p3865_p1 = por %p3864_p10, %p3863_p5 }
  0x83   : > { %p3859_p9 = pneg %p3858_p7 }
  0x85   : > { %p3866_p3 = pnand %p3865_p1, %p3859_p9 }
  0x87   : > { %3869 = shalt.err (!%p3866_p3)
}
  0x88   : > { %3533 = dma.hbm_to_vmem [thread:$0]  (!%p4841_p6), %s5884_s1, 256, %s703_s0, [#allocation15], %s5818_s25, %s5818_s25, %s5819_s22  }
  0x89   : > { %s4629_s12 = smov [#allocation17]   ;;  %s4630_s16 = smov [#allocation20]  }
  0x8a   : > { %s727_s14 = sshll.u32 %s4629_s12, 4  ;;  %s748_s30 = sshll.u32 %s4630_s16, 4  ;;  %s728_s14 = int_to_ptr.vmem [resolvable:$true] %s727_s14  ;;  %s749_s30 = int_to_ptr.vmem [resolvable:$true] %s748_s30 }
  0x8b   : > { %s5885_s20 = sld [smem:[#allocation72_spill]] }
  0x91   : > { %s3870_s27 = scalar_lea.hbm %s5885_s20, 16 }
  0x92   : > { %p3871_p1 = scmp.ne.s32.totalorder %s5885_s20, %s3870_s27  ;;  %p3877_p12 = scmp.lt.u32.totalorder %s3870_s27, %s5885_s20 }
  0x94   : > { %p3873_p3 = pnand %p3871_p1, %p4857_p8 }
  0x96   : > { %p3874_p11 = pneg %p3873_p3 }
  0x98   : > { %p3879_p13 = pnand %p3877_p12, %p3874_p11 }
  0x9a   : > { %3882 = shalt.err (!%p3879_p13)
}
  0x9b   : > { %s3883_s0 = scalar_lea.vmem %s728_s14, 16  ;;  %s3890_s9 = scalar_lea.vmem %s728_s14, 32 }
  0x9c   : > { %p3884_p0 = scmp.ne.s32.totalorder %s728_s14, %s3883_s0  ;;  %p3891_p7 = scmp.lt.s32.totalorder %s728_s14, %s728_s14 }
  0x9d   : > { %p3892_p9 = scmp.lt.s32.totalorder %s3890_s9, %s3883_s0 }
  0x9e   : > { %p3886_p2 = pnand %p3884_p0, %p4857_p8 }
  0x9f   : > { %p3893_p5 = por %p3892_p9, %p3891_p7 }
  0xa0   : > { %p3887_p4 = pneg %p3886_p2 }
  0xa2   : > { %p3894_p10 = pnand %p3893_p5, %p3887_p4 }
  0xa4   : > { %3897 = shalt.err (!%p3894_p10)
}
  0xa5   : > { %3539 = dma.hbm_to_vmem [thread:$0]  (!%p4841_p6), %s5885_s20, 16, %s728_s14, [#allocation18]  }
  0xa6   : > { %s5886_s11 = sld [smem:[#allocation74_spill]] }
  0xac   : > { %s3898_s8 = scalar_lea.hbm %s5886_s11, 256 }
  0xad   : > { %p3899_p1 = scmp.ne.s32.totalorder %s5886_s11, %s3898_s8  ;;  %p3905_p12 = scmp.lt.u32.totalorder %s3898_s8, %s5886_s11 }
  0xaf   : > { %p3901_p3 = pnand %p3899_p1, %p4857_p8 }
  0xb1   : > { %p3902_p11 = pneg %p3901_p3 }
  0xb3   : > { %p3907_p13 = pnand %p3905_p12, %p3902_p11 }
  0xb5   : > { %3910 = shalt.err (!%p3907_p13)
}
  0xb6   : > { %s3911_s0 = scalar_lea.vmem %s749_s30, 256  ;;  %p3919_p7 = scmp.lt.s32.totalorder %s749_s30, %s749_s30 }
  0xb7   : > { %p3912_p0 = scmp.ne.s32.totalorder %s749_s30, %s3911_s0  ;;  %p3920_p9 = scmp.lt.s32.totalorder %s3911_s0, %s3911_s0 }
  0xb9   : > { %p3914_p2 = pnand %p3912_p0, %p4857_p8  ;;  %p3921_p5 = por %p3920_p9, %p3919_p7 }
  0xbb   : > { %p3915_p4 = pneg %p3914_p2 }
  0xbd   : > { %p3922_p10 = pnand %p3921_p5, %p3915_p4 }
  0xbf   : > { %3925 = shalt.err (!%p3922_p10)
}
  0xc0   : > { %3545 = dma.hbm_to_vmem [thread:$0]  (!%p4841_p6), %s5886_s11, 256, %s749_s30, [#allocation21], %s5818_s25, %s5818_s25, %s5819_s22  }
  0xc1   : > { %s4631_s5 = smov [#allocation23]   ;;  %s4632_s26 = smov [#allocation26]  }
  0xc2   : > { %s772_s12 = sshll.u32 %s4631_s5, 4  ;;  %s796_s16 = sshll.u32 %s4632_s26, 4  ;;  %s773_s12 = int_to_ptr.vmem [resolvable:$true] %s772_s12  ;;  %s797_s16 = int_to_ptr.vmem [resolvable:$true] %s796_s16 }
  0xc3   : > { %s5887_s13 = sld [smem:[#allocation76_spill]] }
  0xc9   : > { %s3926_s27 = scalar_lea.hbm %s5887_s13, 256 }
  0xca   : > { %p3927_p1 = scmp.ne.s32.totalorder %s5887_s13, %s3926_s27  ;;  %p3933_p12 = scmp.lt.u32.totalorder %s3926_s27, %s5887_s13 }
  0xcc   : > { %p3929_p3 = pnand %p3927_p1, %p4857_p8 }
  0xce   : > { %p3930_p11 = pneg %p3929_p3 }
  0xd0   : > { %p3935_p13 = pnand %p3933_p12, %p3930_p11 }
  0xd2   : > { %3938 = shalt.err (!%p3935_p13)
}
  0xd3   : > { %s3939_s30 = scalar_lea.vmem %s773_s12, 256  ;;  %p3947_p7 = scmp.lt.s32.totalorder %s773_s12, %s773_s12 }
  0xd4   : > { %p3940_p0 = scmp.ne.s32.totalorder %s773_s12, %s3939_s30  ;;  %p3948_p9 = scmp.lt.s32.totalorder %s3939_s30, %s3939_s30 }
  0xd6   : > { %p3942_p2 = pnand %p3940_p0, %p4857_p8  ;;  %p3949_p5 = por %p3948_p9, %p3947_p7 }
  0xd8   : > { %p3943_p4 = pneg %p3942_p2 }
  0xda   : > { %p3950_p10 = pnand %p3949_p5, %p3943_p4 }
  0xdc   : > { %3953 = shalt.err (!%p3950_p10)
}
  0xdd   : > { %3551 = dma.hbm_to_vmem [thread:$0]  (!%p4841_p6), %s5887_s13, 256, %s773_s12, [#allocation24], %s5818_s25, %s5818_s25, %s5819_s22  }
  0xde   : > { %s5888_s15 = sld [smem:[#allocation78_spill]] }
  0xe4   : > { %s3954_s28 = scalar_lea.hbm %s5888_s15, 256 }
  0xe5   : > { %p3955_p1 = scmp.ne.s32.totalorder %s5888_s15, %s3954_s28  ;;  %p3961_p12 = scmp.lt.u32.totalorder %s3954_s28, %s5888_s15 }
  0xe7   : > { %p3957_p3 = pnand %p3955_p1, %p4857_p8 }
  0xe9   : > { %p3958_p11 = pneg %p3957_p3 }
  0xeb   : > { %p3963_p13 = pnand %p3961_p12, %p3958_p11 }
  0xed   : > { %3966 = shalt.err (!%p3963_p13)
}
  0xee   : > { %s3967_s14 = scalar_lea.vmem %s797_s16, 256  ;;  %p3975_p7 = scmp.lt.s32.totalorder %s797_s16, %s797_s16 }
  0xef   : > { %p3968_p0 = scmp.ne.s32.totalorder %s797_s16, %s3967_s14  ;;  %p3976_p9 = scmp.lt.s32.totalorder %s3967_s14, %s3967_s14 }
  0xf1   : > { %p3970_p2 = pnand %p3968_p0, %p4857_p8  ;;  %p3977_p5 = por %p3976_p9, %p3975_p7 }
  0xf3   : > { %p3971_p4 = pneg %p3970_p2 }
  0xf5   : > { %p3978_p10 = pnand %p3977_p5, %p3971_p4 }
  0xf7   : > { %3981 = shalt.err (!%p3978_p10)
}
  0xf8   : > { %3557 = dma.hbm_to_vmem [thread:$0]  (!%p4841_p6), %s5888_s15, 256, %s797_s16, [#allocation27], %s5818_s25, %s5818_s25, %s5819_s22  }
  0xf9   : > { %s4633_s9 = smov [#allocation29]   ;;  %s4634_s26 = smov [#allocation32]  }
  0xfa   : > { %s821_s5 = sshll.u32 %s4633_s9, 4  ;;  %s842_s8 = sshll.u32 %s4634_s26, 4  ;;  %s822_s5 = int_to_ptr.vmem [resolvable:$true] %s821_s5  ;;  %s843_s8 = int_to_ptr.vmem [resolvable:$true] %s842_s8 }
  0xfb   : > { %s5889_s17 = sld [smem:[#allocation80_spill]] }
 0x101   : > { %s3982_s10 = scalar_lea.hbm %s5889_s17, 16 }
 0x102   : > { %p3983_p1 = scmp.ne.s32.totalorder %s5889_s17, %s3982_s10  ;;  %p3989_p12 = scmp.lt.u32.totalorder %s3982_s10, %s5889_s17 }
 0x104   : > { %p3985_p3 = pnand %p3983_p1, %p4857_p8 }
 0x106   : > { %p3986_p11 = pneg %p3985_p3 }
 0x108   : > { %p3991_p13 = pnand %p3989_p12, %p3986_p11 }
 0x10a   : > { %3994 = shalt.err (!%p3991_p13)
}
 0x10b   : > { %s3995_s16 = scalar_lea.vmem %s822_s5, 16  ;;  %s4002_s30 = scalar_lea.vmem %s822_s5, 32 }
 0x10c   : > { %p3996_p0 = scmp.ne.s32.totalorder %s822_s5, %s3995_s16  ;;  %p4003_p7 = scmp.lt.s32.totalorder %s822_s5, %s822_s5 }
 0x10d   : > { %p4004_p9 = scmp.lt.s32.totalorder %s4002_s30, %s3995_s16 }
 0x10e   : > { %p3998_p2 = pnand %p3996_p0, %p4857_p8 }
 0x10f   : > { %p4005_p5 = por %p4004_p9, %p4003_p7 }
 0x110   : > { %p3999_p4 = pneg %p3998_p2 }
 0x112   : > { %p4006_p10 = pnand %p4005_p5, %p3999_p4 }
 0x114   : > { %4009 = shalt.err (!%p4006_p10)
}
 0x115   : > { %3563 = dma.hbm_to_vmem [thread:$0]  (!%p4841_p6), %s5889_s17, 16, %s822_s5, [#allocation30]  }
 0x116   : > { %s5890_s19 = sld [smem:[#allocation82_spill]] }
 0x11c   : > { %s4010_s10 = scalar_lea.hbm %s5890_s19, 256 }
 0x11d   : > { %p4011_p1 = scmp.ne.s32.totalorder %s5890_s19, %s4010_s10  ;;  %p4017_p12 = scmp.lt.u32.totalorder %s4010_s10, %s5890_s19 }
 0x11f   : > { %p4013_p3 = pnand %p4011_p1, %p4857_p8 }
 0x121   : > { %p4014_p11 = pneg %p4013_p3 }
 0x123   : > { %p4019_p13 = pnand %p4017_p12, %p4014_p11 }
 0x125   : > { %4022 = shalt.err (!%p4019_p13)
}
 0x126   : > { %s4023_s16 = scalar_lea.vmem %s843_s8, 256  ;;  %p4031_p7 = scmp.lt.s32.totalorder %s843_s8, %s843_s8 }
 0x127   : > { %p4024_p0 = scmp.ne.s32.totalorder %s843_s8, %s4023_s16  ;;  %p4032_p9 = scmp.lt.s32.totalorder %s4023_s16, %s4023_s16 }
 0x129   : > { %p4026_p2 = pnand %p4024_p0, %p4857_p8  ;;  %p4033_p5 = por %p4032_p9, %p4031_p7 }
 0x12b   : > { %p4027_p4 = pneg %p4026_p2 }
 0x12d   : > { %p4034_p10 = pnand %p4033_p5, %p4027_p4 }
 0x12f   : > { %4037 = shalt.err (!%p4034_p10)
}
 0x130   : > { %3569 = dma.hbm_to_vmem [thread:$0]  (!%p4841_p6), %s5890_s19, 256, %s843_s8, [#allocation33], %s5818_s25, %s5818_s25, %s5819_s22  }
 0x131   : > { %s4635_s9 = smov [#allocation35]   ;;  %s4636_s28 = smov [#allocation38]  }
 0x132   : > { %s866_s26 = sshll.u32 %s4635_s9, 4  ;;  %s891_s27 = sshll.u32 %s4636_s28, 4  ;;  %s867_s26 = int_to_ptr.vmem [resolvable:$true] %s866_s26  ;;  %s892_s27 = int_to_ptr.vmem [resolvable:$true] %s891_s27 }
 0x133   : > { %s5891_s21 = sld [smem:[#allocation84_spill]] }
 0x139   : > { %s4038_s0 = scalar_lea.hbm %s5891_s21, 512 }
 0x13a   : > { %p4039_p1 = scmp.ne.s32.totalorder %s5891_s21, %s4038_s0  ;;  %p4045_p12 = scmp.lt.u32.totalorder %s4038_s0, %s5891_s21 }
 0x13c   : > { %p4041_p3 = pnand %p4039_p1, %p4857_p8 }
 0x13e   : > { %p4042_p11 = pneg %p4041_p3 }
 0x140   : > { %p4047_p13 = pnand %p4045_p12, %p4042_p11 }
 0x142   : > { %4050 = shalt.err (!%p4047_p13)
}
 0x143   : > { %s4051_s8 = scalar_lea.vmem %s867_s26, 512  ;;  %p4059_p7 = scmp.lt.s32.totalorder %s867_s26, %s867_s26 }
 0x144   : > { %p4052_p0 = scmp.ne.s32.totalorder %s867_s26, %s4051_s8  ;;  %p4060_p9 = scmp.lt.s32.totalorder %s4051_s8, %s4051_s8 }
 0x146   : > { %p4054_p2 = pnand %p4052_p0, %p4857_p8  ;;  %p4061_p5 = por %p4060_p9, %p4059_p7 }
 0x148   : > { %p4055_p4 = pneg %p4054_p2 }
 0x14a   : > { %p4062_p10 = pnand %p4061_p5, %p4055_p4 }
 0x14c   : > { %4065 = shalt.err (!%p4062_p10)
}
 0x14d   : > { %3575 = dma.hbm_to_vmem [thread:$0]  (!%p4841_p6), %s5891_s21, 512, %s867_s26, [#allocation36], %s5818_s25, %s5818_s25, %s5819_s22  }
 0x14e   : > { %s5892_s23 = sld [smem:[#allocation86_spill]] }
 0x154   : > { %s4066_s24 = scalar_lea.hbm %s5892_s23, 16 }
 0x155   : > { %p4067_p1 = scmp.ne.s32.totalorder %s5892_s23, %s4066_s24  ;;  %p4073_p12 = scmp.lt.u32.totalorder %s4066_s24, %s5892_s23 }
 0x157   : > { %p4069_p3 = pnand %p4067_p1, %p4857_p8 }
 0x159   : > { %p4070_p11 = pneg %p4069_p3 }
 0x15b   : > { %p4075_p13 = pnand %p4073_p12, %p4070_p11 }
 0x15d   : > { %4078 = shalt.err (!%p4075_p13)
}
 0x15e   : > { %s4079_s5 = scalar_lea.vmem %s892_s27, 16  ;;  %s4086_s26 = scalar_lea.vmem %s892_s27, 32 }
 0x15f   : > { %p4080_p0 = scmp.ne.s32.totalorder %s892_s27, %s4079_s5  ;;  %p4087_p7 = scmp.lt.s32.totalorder %s892_s27, %s892_s27 }
 0x160   : > { %p4088_p9 = scmp.lt.s32.totalorder %s4086_s26, %s4079_s5 }
 0x161   : > { %p4082_p2 = pnand %p4080_p0, %p4857_p8 }
 0x162   : > { %p4089_p5 = por %p4088_p9, %p4087_p7 }
 0x163   : > { %p4083_p4 = pneg %p4082_p2 }
 0x165   : > { %p4090_p10 = pnand %p4089_p5, %p4083_p4 }
 0x167   : > { %4093 = shalt.err (!%p4090_p10)
}
 0x168   : > { %s5893_s9 = sld [smem:[#allocation59_spill]]  ;;  %s3079_s28 = sadd.s32 4294967294, %s4622_s3  }
 0x169   : > { %3581 = dma.hbm_to_vmem [thread:$0]  (!%p4841_p6), %s5892_s23, 16, %s892_s27, [#allocation39]  }
 0x16a   : > { %s67_s10 = sadd.s32 1, %s4618_s7  ;;  %s76_s24 = sadd.s32 1, %s4610_s6 }
 0x16b   : > { %p69_p1 = scmp.ge.s32.totalorder %s67_s10, 2  ;;  %p83_p3 = scmp.ne.s32.totalorder %s4610_s6, %s4606_s2 }
 0x16c   : > { %p84_p11 = scmp.eq.s32.totalorder %s4622_s3, 0  ;;  %p89_p12 = scmp.ne.s32.totalorder %s4606_s2, %s4602_s29 }
 0x16d   : > { %s5963_s10 = smov (%p69_p1, %s67_s10), 0  ;;  %p635_p9 = scmp.eq.s32.totalorder %s3079_s28, 1 }
 0x16e   : > { %5894 = sst [smem:[#allocation61_spill]] %s5963_s10  ;;  %p5098_p13 = por %p84_p11, %p83_p3 }
 0x16f   : > { %p5896_p0 = scmp.eq.s32.totalorder %s5893_s9, 0  ;;  %s71_s14 = ssub.s32 %s4618_s7, %s5963_s10 }
 0x170   : > { %p629_p4 = scmp.eq.s32.totalorder %s5893_s9, 1  ;;  %p74_p7 = scmp.eq.s32.totalorder %s71_s14, 0 }
 0x171   : > { %p5104_p2 = por %p5896_p0, %p89_p12  ;;  %p3621_p10 = scmp.lt.s32.totalorder %s4622_s3, 2 }
 0x172   : > { %p5111_p5 = por %p629_p4, %p83_p3  ;;  %p5119_p1 = por %p635_p9, %p89_p12 }
 0x173   : > { %s5897_s27 = scalar_select %p5104_p2, 1, 0 }
 0x174   : > { %s5898_s12 = scalar_select %p5111_p5, 1, 0 }
 0x175   : > { %s5117_s16 = scalar_select %p74_p7, %s4610_s6, %s76_s24  }
 0x176   : > { %s5900_s5 = scalar_select %p5119_p1, 1, 0 }
 0x177   : > { %5899 = sst [smem:[#allocation62_spill]] %s5117_s16  ;;  %s5820_s26 = sand.u32 1, %s4610_s6  }
 0x178   : > { %s5126_s8 = sshll.u32 %s5820_s26, 3  ;;  %s5129_s30 = sshll.u32 %s4618_s7, 7 }
 0x179   : > { %p5133_p3 = pnand %p3621_p10, %p5098_p13  ;;  %s932_s28 = sand.u32 1, %s4622_s3  }
 0x17a   : > { %s5902_s25 = sld [smem:[#allocation64_spill]]  ;;  %s936_s26 = scalar_lea.vmem [#allocation5], %s5126_s8 }
 0x17b   : > { %s5901_s9 = scalar_select %p5133_p3, 1, 0 }
 0x17c   : > { %s943_s1 = sshll.u32 %s936_s26, 4  ;;  %s5147_s0 = scalar_lea.sflag [#allocation6], %s932_s28  ;;  %s5145_s1 = int_to_ptr.vmem [resolvable:$true] %s943_s1 }
 0x17d   : > { %p5153_p12 = pneg %p5133_p3 }
 0x17f   : > { %s5903_s13 = scalar_select %p5153_p12, 1, 0 }
 0x180   : > { %s5142_s22 = scalar_lea.hbm %s5902_s25, %s5129_s30  ;;  %s4099_s15 = scalar_lea.hbm %s5902_s25, 256 }
 0x181   : > { %s4094_s11 = scalar_lea.hbm %s5142_s22, 128  ;;  %p4100_p4 = scmp.lt.u32.totalorder %s5142_s22, %s5902_s25 }
 0x182   : > { %p4095_p11 = scmp.ne.s32.totalorder %s5142_s22, %s4094_s11  ;;  %p4101_p7 = scmp.lt.u32.totalorder %s4099_s15, %s4094_s11 }
 0x183   : > { %p4103_p10 = scmp.lt.u32.totalorder %s4094_s11, %s5142_s22 }
 0x184   : > { %p4097_p13 = pnand %p5153_p12, %p4095_p11  ;;  %p4102_p9 = por %p4101_p7, %p4100_p4 }
 0x186   : > { %p4098_p0 = pneg %p4097_p13  ;;  %p4104_p1 = por %p4103_p10, %p4102_p9 }
 0x188   : > { %p4105_p5 = pnand %p4104_p1, %p4098_p0 }
 0x18a   : > { %4108 = shalt.err (!%p4105_p5)
}
 0x18b   : > { %s4109_s28 = scalar_lea.vmem %s5145_s1, 128  ;;  %s4637_s24 = smov [#allocation5]  }
 0x18c   : > { %p4110_p11 = scmp.ne.s32.totalorder %s5145_s1, %s4109_s28  ;;  %s4114_s14 = sshll.u32 %s4637_s24, 4  ;;  %s4115_s14 = int_to_ptr.vmem [resolvable:$false] %s4114_s14 }
 0x18d   : > { %s4116_s17 = scalar_lea.vmem %s4115_s14, 256  ;;  %p4117_p6 = scmp.lt.s32.totalorder %s5145_s1, %s4115_s14 }
 0x18e   : > { %p4112_p13 = pnand %p4110_p11, %p5153_p12  ;;  %p4118_p8 = scmp.lt.s32.totalorder %s4116_s17, %s4109_s28 }
 0x190   : > { %p4113_p2 = pneg %p4112_p13  ;;  %p4119_p4 = por %p4118_p8, %p4117_p6 }
 0x192   : > { %p4120_p7 = pnand %p4119_p4, %p4113_p2 }
 0x194   : > { %4123 = shalt.err (!%p4120_p7)
}
 0x195   : > { %3591 = dma.hbm_to_vmem [thread:$0]  (!%p5133_p3), %s5142_s22, 128, %s5145_s1, %s5147_s0  }
 0x196   : > { %s5904_s26 = sld [smem:[#allocation65_spill]]  ;;  %s954_s19 = scalar_lea.vmem [#allocation7], %s5126_s8 }
 0x197   : > { %s5184_s14 = sshll.u32 %s954_s19, 4  ;;  %s4638_s28 = smov [#allocation10]   ;;  %s5391_s14 = int_to_ptr.vmem [resolvable:$true] %s5184_s14 }
 0x198   : > { %s668_s17 = sshll.u32 %s4638_s28, 4  ;;  %s5905_s23 = sld [smem:[#allocation67_spill]]  ;;  %s669_s17 = int_to_ptr.vmem [resolvable:$true] %s668_s17 }
 0x199   : > { %p5906_p8 = scmp.ne.s32.totalorder %s5881_s18, 0 }
 0x19c   : > { %s5181_s24 = scalar_lea.hbm %s5904_s26, %s5129_s30 }
 0x19e   : > { %s4124_s25 = scalar_lea.hbm %s5905_s23, 16 }
 0x19f   : > { %p4125_p6 = scmp.ne.s32.totalorder %s5905_s23, %s4124_s25  ;;  %p4131_p1 = scmp.lt.u32.totalorder %s4124_s25, %s5905_s23 }
 0x1a1   : > { %p4127_p2 = pnand %p4125_p6, %p5906_p8 }
 0x1a3   : > { %p4128_p5 = pneg %p4127_p2 }
 0x1a5   : > { %p4133_p0 = pnand %p4131_p1, %p4128_p5 }
 0x1a7   : > { %4136 = shalt.err (!%p4133_p0)
}
 0x1a8   : > { %s4137_s19 = scalar_lea.vmem %s669_s17, 16  ;;  %s4144_s21 = scalar_lea.vmem %s669_s17, 32 }
 0x1a9   : > { %p4138_p9 = scmp.ne.s32.totalorder %s669_s17, %s4137_s19  ;;  %p4145_p13 = scmp.lt.s32.totalorder %s669_s17, %s669_s17 }
 0x1aa   : > { %p4146_p4 = scmp.lt.s32.totalorder %s4144_s21, %s4137_s19 }
 0x1ab   : > { %p4140_p10 = pnand %p4138_p9, %p5906_p8 }
 0x1ac   : > { %p4147_p7 = por %p4146_p4, %p4145_p13 }
 0x1ad   : > { %p4141_p11 = pneg %p4140_p10 }
 0x1af   : > { %p4148_p3 = pnand %p4147_p7, %p4141_p11 }
 0x1b1   : > { %4151 = shalt.err (!%p4148_p3)
}
 0x1b2   : > { %p5907_p6 = scmp.ne.s32.totalorder %s5878_s4, 0  ;;  %s4639_s25 = smov [#allocation13]  }
 0x1b3   : > { %s692_s10 = sshll.u32 %s4639_s25, 4  ;;  %s4640_s11 = smov [#allocation16]   ;;  %s693_s10 = int_to_ptr.vmem [resolvable:$true] %s692_s10 }
 0x1b4   : > { %3524 = dma.hbm_to_vmem [thread:$0]  (!%p5907_p6), %s5905_s23, 16, %s669_s17, [#allocation9]  }
 0x1b5   : > { %s716_s15 = sshll.u32 %s4640_s11, 4  ;;  %s5908_s1 = sld [smem:[#allocation69_spill]]  ;;  %s717_s15 = int_to_ptr.vmem [resolvable:$true] %s716_s15 }
 0x1bb   : > { %s4152_s16 = scalar_lea.hbm %s5908_s1, 16 }
 0x1bc   : > { %p4153_p3 = scmp.ne.s32.totalorder %s5908_s1, %s4152_s16  ;;  %p4159_p1 = scmp.lt.u32.totalorder %s4152_s16, %s5908_s1 }
 0x1be   : > { %p4155_p2 = pnand %p4153_p3, %p5906_p8 }
 0x1c0   : > { %p4156_p5 = pneg %p4155_p2 }
 0x1c2   : > { %p4161_p0 = pnand %p4159_p1, %p4156_p5 }
 0x1c4   : > { %4164 = shalt.err (!%p4161_p0)
}
 0x1c5   : > { %s4165_s17 = scalar_lea.vmem %s693_s10, 16  ;;  %s4172_s20 = scalar_lea.vmem %s693_s10, 32 }
 0x1c6   : > { %p4166_p9 = scmp.ne.s32.totalorder %s693_s10, %s4165_s17  ;;  %p4173_p13 = scmp.lt.s32.totalorder %s693_s10, %s693_s10 }
 0x1c7   : > { %p4174_p4 = scmp.lt.s32.totalorder %s4172_s20, %s4165_s17 }
 0x1c8   : > { %p4168_p10 = pnand %p4166_p9, %p5906_p8 }
 0x1c9   : > { %p4175_p7 = por %p4174_p4, %p4173_p13 }
 0x1ca   : > { %p4169_p11 = pneg %p4168_p10 }
 0x1cc   : > { %p4176_p12 = pnand %p4175_p7, %p4169_p11 }
 0x1ce   : > { %4179 = shalt.err (!%p4176_p12)
}
 0x1cf   : > { %3530 = dma.hbm_to_vmem [thread:$0]  (!%p5907_p6), %s5908_s1, 16, %s693_s10, [#allocation12]  }
 0x1d0   : > { %s5909_s28 = sld [smem:[#allocation71_spill]] }
 0x1d6   : > { %s4180_s22 = scalar_lea.hbm %s5909_s28, 16 }
 0x1d7   : > { %p4181_p3 = scmp.ne.s32.totalorder %s5909_s28, %s4180_s22  ;;  %p4187_p12 = scmp.lt.u32.totalorder %s4180_s22, %s5909_s28 }
 0x1d9   : > { %p4183_p2 = pnand %p4181_p3, %p5906_p8 }
 0x1db   : > { %p4184_p5 = pneg %p4183_p2 }
 0x1dd   : > { %p4189_p1 = pnand %p4187_p12, %p4184_p5 }
 0x1df   : > { %4192 = shalt.err (!%p4189_p1)
}
 0x1e0   : > { %s4193_s20 = scalar_lea.vmem %s717_s15, 16  ;;  %s4200_s10 = scalar_lea.vmem %s717_s15, 32 }
 0x1e1   : > { %p4194_p0 = scmp.ne.s32.totalorder %s717_s15, %s4193_s20  ;;  %p4201_p11 = scmp.lt.s32.totalorder %s717_s15, %s717_s15 }
 0x1e2   : > { %p4202_p13 = scmp.lt.s32.totalorder %s4200_s10, %s4193_s20 }
 0x1e3   : > { %p4196_p9 = pnand %p4194_p0, %p5906_p8 }
 0x1e4   : > { %p4203_p4 = por %p4202_p13, %p4201_p11 }
 0x1e5   : > { %p4197_p10 = pneg %p4196_p9 }
 0x1e7   : > { %p4204_p7 = pnand %p4203_p4, %p4197_p10 }
 0x1e9   : > { %4207 = shalt.err (!%p4204_p7)
}
 0x1ea   : > { %3536 = dma.hbm_to_vmem [thread:$0]  (!%p5907_p6), %s5909_s28, 16, %s717_s15, [#allocation15]  }
 0x1eb   : > { %s4641_s3 = smov [#allocation19]   ;;  %s4642_s22 = smov [#allocation22]  }
 0x1ec   : > { %s738_s16 = sshll.u32 %s4641_s3, 4  ;;  %s762_s19 = sshll.u32 %s4642_s22, 4  ;;  %s739_s16 = int_to_ptr.vmem [resolvable:$true] %s738_s16  ;;  %s763_s19 = int_to_ptr.vmem [resolvable:$true] %s762_s19 }
 0x1ed   : > { %s5910_s17 = sld [smem:[#allocation73_spill]] }
 0x1f3   : > { %s4208_s1 = scalar_lea.hbm %s5910_s17, 16 }
 0x1f4   : > { %p4209_p3 = scmp.ne.s32.totalorder %s5910_s17, %s4208_s1  ;;  %p4215_p12 = scmp.lt.u32.totalorder %s4208_s1, %s5910_s17 }
 0x1f6   : > { %p4211_p2 = pnand %p4209_p3, %p5906_p8 }
 0x1f8   : > { %p4212_p5 = pneg %p4211_p2 }
 0x1fa   : > { %p4217_p1 = pnand %p4215_p12, %p4212_p5 }
 0x1fc   : > { %4220 = shalt.err (!%p4217_p1)
}
 0x1fd   : > { %s4221_s15 = scalar_lea.vmem %s739_s16, 16  ;;  %s4228_s11 = scalar_lea.vmem %s739_s16, 32 }
 0x1fe   : > { %p4222_p0 = scmp.ne.s32.totalorder %s739_s16, %s4221_s15  ;;  %p4229_p11 = scmp.lt.s32.totalorder %s739_s16, %s739_s16 }
 0x1ff   : > { %p4230_p13 = scmp.lt.s32.totalorder %s4228_s11, %s4221_s15 }
 0x200   : > { %p4224_p9 = pnand %p4222_p0, %p5906_p8 }
 0x201   : > { %p4231_p4 = por %p4230_p13, %p4229_p11 }
 0x202   : > { %p4225_p10 = pneg %p4224_p9 }
 0x204   : > { %p4232_p7 = pnand %p4231_p4, %p4225_p10 }
 0x206   : > { %4235 = shalt.err (!%p4232_p7)
}
 0x207   : > { %3542 = dma.hbm_to_vmem [thread:$0]  (!%p5907_p6), %s5910_s17, 16, %s739_s16, [#allocation18]  }
 0x208   : > { %s5911_s21 = sld [smem:[#allocation75_spill]] }
 0x20e   : > { %s4236_s7 = scalar_lea.hbm %s5911_s21, 16 }
 0x20f   : > { %p4237_p3 = scmp.ne.s32.totalorder %s5911_s21, %s4236_s7  ;;  %p4243_p12 = scmp.lt.u32.totalorder %s4236_s7, %s5911_s21 }
 0x211   : > { %p4239_p2 = pnand %p4237_p3, %p5906_p8 }
 0x213   : > { %p4240_p5 = pneg %p4239_p2 }
 0x215   : > { %p4245_p1 = pnand %p4243_p12, %p4240_p5 }
 0x217   : > { %4248 = shalt.err (!%p4245_p1)
}
 0x218   : > { %s4249_s11 = scalar_lea.vmem %s763_s19, 16  ;;  %s4256_s16 = scalar_lea.vmem %s763_s19, 32 }
 0x219   : > { %p4250_p0 = scmp.ne.s32.totalorder %s763_s19, %s4249_s11  ;;  %p4257_p11 = scmp.lt.s32.totalorder %s763_s19, %s763_s19 }
 0x21a   : > { %p4258_p13 = scmp.lt.s32.totalorder %s4256_s16, %s4249_s11 }
 0x21b   : > { %p4252_p9 = pnand %p4250_p0, %p5906_p8 }
 0x21c   : > { %p4259_p4 = por %p4258_p13, %p4257_p11 }
 0x21d   : > { %p4253_p10 = pneg %p4252_p9 }
 0x21f   : > { %p4260_p7 = pnand %p4259_p4, %p4253_p10 }
 0x221   : > { %4263 = shalt.err (!%p4260_p7)
}
 0x222   : > { %3548 = dma.hbm_to_vmem [thread:$0]  (!%p5907_p6), %s5911_s21, 16, %s763_s19, [#allocation21]  }
 0x223   : > { %s4643_s23 = smov [#allocation25]   ;;  %s4644_s7 = smov [#allocation28]  }
 0x224   : > { %s786_s1 = sshll.u32 %s4643_s23, 4  ;;  %s810_s20 = sshll.u32 %s4644_s7, 4  ;;  %s787_s1 = int_to_ptr.vmem [resolvable:$true] %s786_s1  ;;  %s811_s20 = int_to_ptr.vmem [resolvable:$true] %s810_s20 }
 0x225   : > { %s5912_s15 = sld [smem:[#allocation77_spill]] }
 0x22b   : > { %s4264_s17 = scalar_lea.hbm %s5912_s15, 16 }
 0x22c   : > { %p4265_p3 = scmp.ne.s32.totalorder %s5912_s15, %s4264_s17  ;;  %p4271_p12 = scmp.lt.u32.totalorder %s4264_s17, %s5912_s15 }
 0x22e   : > { %p4267_p2 = pnand %p4265_p3, %p5906_p8 }
 0x230   : > { %p4268_p5 = pneg %p4267_p2 }
 0x232   : > { %p4273_p1 = pnand %p4271_p12, %p4268_p5 }
 0x234   : > { %4276 = shalt.err (!%p4273_p1)
}
 0x235   : > { %s4277_s19 = scalar_lea.vmem %s787_s1, 16  ;;  %s4284_s22 = scalar_lea.vmem %s787_s1, 32 }
 0x236   : > { %p4278_p0 = scmp.ne.s32.totalorder %s787_s1, %s4277_s19  ;;  %p4285_p11 = scmp.lt.s32.totalorder %s787_s1, %s787_s1 }
 0x237   : > { %p4286_p13 = scmp.lt.s32.totalorder %s4284_s22, %s4277_s19 }
 0x238   : > { %p4280_p9 = pnand %p4278_p0, %p5906_p8 }
 0x239   : > { %p4287_p4 = por %p4286_p13, %p4285_p11 }
 0x23a   : > { %p4281_p10 = pneg %p4280_p9 }
 0x23c   : > { %p4288_p7 = pnand %p4287_p4, %p4281_p10 }
 0x23e   : > { %4291 = shalt.err (!%p4288_p7)
}
 0x23f   : > { %3554 = dma.hbm_to_vmem [thread:$0]  (!%p5907_p6), %s5912_s15, 16, %s787_s1, [#allocation24]  }
 0x240   : > { %s5913_s10 = sld [smem:[#allocation79_spill]] }
 0x246   : > { %s4292_s25 = scalar_lea.hbm %s5913_s10, 16 }
 0x247   : > { %p4293_p3 = scmp.ne.s32.totalorder %s5913_s10, %s4292_s25  ;;  %p4299_p12 = scmp.lt.u32.totalorder %s4292_s25, %s5913_s10 }
 0x249   : > { %p4295_p2 = pnand %p4293_p3, %p5906_p8 }
 0x24b   : > { %p4296_p5 = pneg %p4295_p2 }
 0x24d   : > { %p4301_p1 = pnand %p4299_p12, %p4296_p5 }
 0x24f   : > { %4304 = shalt.err (!%p4301_p1)
}
 0x250   : > { %s4305_s22 = scalar_lea.vmem %s811_s20, 16  ;;  %s4312_s1 = scalar_lea.vmem %s811_s20, 32 }
 0x251   : > { %p4306_p0 = scmp.ne.s32.totalorder %s811_s20, %s4305_s22  ;;  %p4313_p11 = scmp.lt.s32.totalorder %s811_s20, %s811_s20 }
 0x252   : > { %p4314_p13 = scmp.lt.s32.totalorder %s4312_s1, %s4305_s22 }
 0x253   : > { %p4308_p9 = pnand %p4306_p0, %p5906_p8 }
 0x254   : > { %p4315_p4 = por %p4314_p13, %p4313_p11 }
 0x255   : > { %p4309_p10 = pneg %p4308_p9 }
 0x257   : > { %p4316_p7 = pnand %p4315_p4, %p4309_p10 }
 0x259   : > { %4319 = shalt.err (!%p4316_p7)
}
 0x25a   : > { %3560 = dma.hbm_to_vmem [thread:$0]  (!%p5907_p6), %s5913_s10, 16, %s811_s20, [#allocation27]  }
 0x25b   : > { %s4645_s28 = smov [#allocation31]   ;;  %s4646_s25 = smov [#allocation34]  }
 0x25c   : > { %s832_s17 = sshll.u32 %s4645_s28, 4  ;;  %s856_s11 = sshll.u32 %s4646_s25, 4  ;;  %s833_s17 = int_to_ptr.vmem [resolvable:$true] %s832_s17  ;;  %s857_s11 = int_to_ptr.vmem [resolvable:$true] %s856_s11 }
 0x25d   : > { %s5914_s19 = sld [smem:[#allocation81_spill]] }
 0x263   : > { %s4320_s15 = scalar_lea.hbm %s5914_s19, 16 }
 0x264   : > { %p4321_p3 = scmp.ne.s32.totalorder %s5914_s19, %s4320_s15  ;;  %p4327_p12 = scmp.lt.u32.totalorder %s4320_s15, %s5914_s19 }
 0x266   : > { %p4323_p2 = pnand %p4321_p3, %p5906_p8 }
 0x268   : > { %p4324_p5 = pneg %p4323_p2 }
 0x26a   : > { %p4329_p1 = pnand %p4327_p12, %p4324_p5 }
 0x26c   : > { %4332 = shalt.err (!%p4329_p1)
}
 0x26d   : > { %s4333_s20 = scalar_lea.vmem %s833_s17, 16  ;;  %s4340_s7 = scalar_lea.vmem %s833_s17, 32 }
 0x26e   : > { %p4334_p0 = scmp.ne.s32.totalorder %s833_s17, %s4333_s20  ;;  %p4341_p11 = scmp.lt.s32.totalorder %s833_s17, %s833_s17 }
 0x26f   : > { %p4342_p13 = scmp.lt.s32.totalorder %s4340_s7, %s4333_s20 }
 0x270   : > { %p4336_p9 = pnand %p4334_p0, %p5906_p8 }
 0x271   : > { %p4343_p4 = por %p4342_p13, %p4341_p11 }
 0x272   : > { %p4337_p10 = pneg %p4336_p9 }
 0x274   : > { %p4344_p7 = pnand %p4343_p4, %p4337_p10 }
 0x276   : > { %4347 = shalt.err (!%p4344_p7)
}
 0x277   : > { %3566 = dma.hbm_to_vmem [thread:$0]  (!%p5907_p6), %s5914_s19, 16, %s833_s17, [#allocation30]  }
 0x278   : > { %s5915_s16 = sld [smem:[#allocation83_spill]] }
 0x27e   : > { %s4348_s3 = scalar_lea.hbm %s5915_s16, 16 }
 0x27f   : > { %p4349_p3 = scmp.ne.s32.totalorder %s5915_s16, %s4348_s3  ;;  %p4355_p12 = scmp.lt.u32.totalorder %s4348_s3, %s5915_s16 }
 0x281   : > { %p4351_p2 = pnand %p4349_p3, %p5906_p8 }
 0x283   : > { %p4352_p5 = pneg %p4351_p2 }
 0x285   : > { %p4357_p1 = pnand %p4355_p12, %p4352_p5 }
 0x287   : > { %4360 = shalt.err (!%p4357_p1)
}
 0x288   : > { %s4361_s7 = scalar_lea.vmem %s857_s11, 16  ;;  %s4368_s17 = scalar_lea.vmem %s857_s11, 32 }
 0x289   : > { %p4362_p0 = scmp.ne.s32.totalorder %s857_s11, %s4361_s7  ;;  %p4369_p11 = scmp.lt.s32.totalorder %s857_s11, %s857_s11 }
 0x28a   : > { %p4370_p13 = scmp.lt.s32.totalorder %s4368_s17, %s4361_s7 }
 0x28b   : > { %p4364_p9 = pnand %p4362_p0, %p5906_p8 }
 0x28c   : > { %p4371_p4 = por %p4370_p13, %p4369_p11 }
 0x28d   : > { %p4365_p10 = pneg %p4364_p9 }
 0x28f   : > { %p4372_p7 = pnand %p4371_p4, %p4365_p10 }
 0x291   : > { %4375 = shalt.err (!%p4372_p7)
}
 0x292   : > { %3572 = dma.hbm_to_vmem [thread:$0]  (!%p5907_p6), %s5915_s16, 16, %s857_s11, [#allocation33]  }
 0x293   : > { %s4647_s21 = smov [#allocation37]   ;;  %s4648_s3 = smov [#allocation40]  }
 0x294   : > { %s880_s15 = sshll.u32 %s4647_s21, 4  ;;  %s902_s22 = sshll.u32 %s4648_s3, 4  ;;  %s881_s15 = int_to_ptr.vmem [resolvable:$true] %s880_s15  ;;  %s903_s22 = int_to_ptr.vmem [resolvable:$true] %s902_s22 }
 0x295   : > { %s5916_s20 = sld [smem:[#allocation85_spill]] }
 0x29b   : > { %s4376_s10 = scalar_lea.hbm %s5916_s20, 16 }
 0x29c   : > { %p4377_p3 = scmp.ne.s32.totalorder %s5916_s20, %s4376_s10  ;;  %p4383_p12 = scmp.lt.u32.totalorder %s4376_s10, %s5916_s20 }
 0x29e   : > { %p4379_p2 = pnand %p4377_p3, %p5906_p8 }
 0x2a0   : > { %p4380_p5 = pneg %p4379_p2 }
 0x2a2   : > { %p4385_p1 = pnand %p4383_p12, %p4380_p5 }
 0x2a4   : > { %4388 = shalt.err (!%p4385_p1)
}
 0x2a5   : > { %s4389_s11 = scalar_lea.vmem %s881_s15, 16  ;;  %s4396_s25 = scalar_lea.vmem %s881_s15, 32 }
 0x2a6   : > { %p4390_p0 = scmp.ne.s32.totalorder %s881_s15, %s4389_s11  ;;  %p4397_p11 = scmp.lt.s32.totalorder %s881_s15, %s881_s15 }
 0x2a7   : > { %p4398_p13 = scmp.lt.s32.totalorder %s4396_s25, %s4389_s11 }
 0x2a8   : > { %p4392_p9 = pnand %p4390_p0, %p5906_p8 }
 0x2a9   : > { %p4399_p4 = por %p4398_p13, %p4397_p11 }
 0x2aa   : > { %p4393_p10 = pneg %p4392_p9 }
 0x2ac   : > { %p4400_p7 = pnand %p4399_p4, %p4393_p10 }
 0x2ae   : > { %4403 = shalt.err (!%p4400_p7)
}
 0x2af   : > { %3578 = dma.hbm_to_vmem [thread:$0]  (!%p5907_p6), %s5916_s20, 16, %s881_s15, [#allocation36]  }
 0x2b0   : > { %s5917_s1 = sld [smem:[#allocation87_spill]] }
 0x2b6   : > { %s4404_s23 = scalar_lea.hbm %s5917_s1, 16 }
 0x2b7   : > { %p4405_p3 = scmp.ne.s32.totalorder %s5917_s1, %s4404_s23  ;;  %p4411_p12 = scmp.lt.u32.totalorder %s4404_s23, %s5917_s1 }
 0x2b9   : > { %p4407_p2 = pnand %p4405_p3, %p5906_p8 }
 0x2bb   : > { %p4408_p5 = pneg %p4407_p2 }
 0x2bd   : > { %p4413_p1 = pnand %p4411_p12, %p4408_p5 }
 0x2bf   : > { %4416 = shalt.err (!%p4413_p1)
}
 0x2c0   : > { %s4417_s25 = scalar_lea.vmem %s903_s22, 16  ;;  %s4424_s15 = scalar_lea.vmem %s903_s22, 32 }
 0x2c1   : > { %p4418_p0 = scmp.ne.s32.totalorder %s903_s22, %s4417_s25  ;;  %p4425_p11 = scmp.lt.s32.totalorder %s903_s22, %s903_s22 }
 0x2c2   : > { %p4426_p13 = scmp.lt.s32.totalorder %s4424_s15, %s4417_s25 }
 0x2c3   : > { %p4420_p9 = pnand %p4418_p0, %p5906_p8 }
 0x2c4   : > { %p4427_p4 = por %p4426_p13, %p4425_p11 }
 0x2c5   : > { %p4421_p10 = pneg %p4420_p9 }
 0x2c7   : > { %p4428_p7 = pnand %p4427_p4, %p4421_p10 }
 0x2c9   : > { %4431 = shalt.err (!%p4428_p7)
}
 0x2ca   : > { %3584 = dma.hbm_to_vmem [thread:$0]  (!%p5907_p6), %s5917_s1, 16, %s903_s22, [#allocation39]  }
 0x2cb   : > { %s5918_s19 = sld [smem:[#allocation63_spill]]  ;;  %s917_s4 = scalar_lea.vmem [#allocation2], %s5126_s8 }
 0x2cc   : > { %s925_s7 = sshll.u32 %s917_s4, 4  ;;  %s5919_s17 = sand.u32 1, %s4610_s6   ;;  %s926_s7 = int_to_ptr.vmem [resolvable:$true] %s925_s7 }
 0x2cd   : > { %s914_s28 = scalar_lea.sflag [#allocation3], %s5919_s17  ;;  %p5920_p3 = scmp.ne.s32.totalorder %s5903_s13, 0 }
 0x2d1   : > { %s5388_s23 = scalar_lea.hbm %s5918_s19, %s5129_s30  ;;  %s4437_s30 = scalar_lea.hbm %s5918_s19, 256 }
 0x2d2   : > { %s4432_s11 = scalar_lea.hbm %s5388_s23, 128  ;;  %p4438_p5 = scmp.lt.u32.totalorder %s5388_s23, %s5918_s19 }
 0x2d3   : > { %p4433_p8 = scmp.ne.s32.totalorder %s5388_s23, %s4432_s11  ;;  %p4439_p12 = scmp.lt.u32.totalorder %s4437_s30, %s4432_s11 }
 0x2d4   : > { %p4441_p0 = scmp.lt.u32.totalorder %s4432_s11, %s5388_s23 }
 0x2d5   : > { %p4435_p6 = pnand %p4433_p8, %p5920_p3  ;;  %p4440_p1 = por %p4439_p12, %p4438_p5 }
 0x2d7   : > { %p4436_p2 = pneg %p4435_p6  ;;  %p4442_p9 = por %p4441_p0, %p4440_p1 }
 0x2d9   : > { %p4443_p10 = pnand %p4442_p9, %p4436_p2 }
 0x2db   : > { %4446 = shalt.err (!%p4443_p10)
}
 0x2dc   : > { %s4447_s8 = scalar_lea.vmem %s926_s7, 128  ;;  %s4649_s3 = smov [#allocation2]  }
 0x2dd   : > { %p4448_p11 = scmp.ne.s32.totalorder %s926_s7, %s4447_s8  ;;  %s4452_s18 = sshll.u32 %s4649_s3, 4  ;;  %s4453_s18 = int_to_ptr.vmem [resolvable:$false] %s4452_s18 }
 0x2de   : > { %s4454_s10 = scalar_lea.vmem %s4453_s18, 256  ;;  %p4455_p7 = scmp.lt.s32.totalorder %s926_s7, %s4453_s18 }
 0x2df   : > { %p4450_p13 = pnand %p4448_p11, %p5920_p3  ;;  %p4456_p8 = scmp.lt.s32.totalorder %s4454_s10, %s4447_s8 }
 0x2e1   : > { %p4451_p4 = pneg %p4450_p13  ;;  %p4457_p6 = por %p4456_p8, %p4455_p7 }
 0x2e3   : > { %p4458_p5 = pnand %p4457_p6, %p4451_p4 }
 0x2e5   : > { %4461 = shalt.err (!%p4458_p5)
}
 0x2e6   : > { %p5921_p12 = scmp.ne.s32.totalorder %s5901_s9, 0  ;;  %s4462_s4 = scalar_lea.hbm %s5181_s24, 128 }
 0x2e7   : > { %p4463_p2 = scmp.ne.s32.totalorder %s5181_s24, %s4462_s4  ;;  %s4467_s22 = scalar_lea.hbm %s5904_s26, 256 }
 0x2e8   : > { %3588 = dma.hbm_to_vmem [thread:$0]  (!%p5921_p12), %s5388_s23, 128, %s926_s7, %s914_s28  }
 0x2e9   : > { %p4465_p1 = pnand %p4463_p2, %p5920_p3  ;;  %p4468_p9 = scmp.lt.u32.totalorder %s5181_s24, %s5904_s26 }
 0x2ea   : > { %p4469_p10 = scmp.lt.u32.totalorder %s4467_s22, %s4462_s4  ;;  %p4471_p13 = scmp.lt.u32.totalorder %s4462_s4, %s5181_s24 }
 0x2eb   : > { %p4466_p0 = pneg %p4465_p1 }
 0x2ec   : > { %p4470_p11 = por %p4469_p10, %p4468_p9 }
 0x2ee   : > { %p4472_p4 = por %p4471_p13, %p4470_p11 }
 0x2f0   : > { %p4473_p7 = pnand %p4472_p4, %p4466_p0 }
 0x2f2   : > { %4476 = shalt.err (!%p4473_p7)
}
 0x2f3   : > { %s4477_s23 = scalar_lea.vmem %s5391_s14, 128  ;;  %s4650_s7 = smov [#allocation7]  }
 0x2f4   : > { %p4478_p8 = scmp.ne.s32.totalorder %s5391_s14, %s4477_s23  ;;  %s4482_s28 = sshll.u32 %s4650_s7, 4  ;;  %s4483_s28 = int_to_ptr.vmem [resolvable:$false] %s4482_s28 }
 0x2f5   : > { %s4484_s15 = scalar_lea.vmem %s4483_s28, 256  ;;  %p4485_p2 = scmp.lt.s32.totalorder %s5391_s14, %s4483_s28 }
 0x2f6   : > { %p4480_p6 = pnand %p4478_p8, %p5920_p3  ;;  %p4486_p1 = scmp.lt.s32.totalorder %s4484_s15, %s4477_s23 }
 0x2f8   : > { %p4481_p5 = pneg %p4480_p6  ;;  %p4487_p9 = por %p4486_p1, %p4485_p2 }
 0x2fa   : > { %p4488_p10 = pnand %p4487_p9, %p4481_p5 }
 0x2fc   : > { %4491 = shalt.err (!%p4488_p10)
}
 0x2fd   : > { %s5922_s21 = smov 4   ;;  %s5923_s8 = smov 64  }
 0x2fe   : > { %3594 = dma.hbm_to_vmem [thread:$0]  (!%p5921_p12), %s5181_s24, 128, %s5391_s14, %s5147_s0, %s5923_s8, %s5923_s8, %s5922_s21  }
 0x2ff   : > { %s5924_s13 = sld [smem:[#allocation60_spill]] }
 0x305   : > { %p5925_p3 = scmp.ne.s32.totalorder %s5924_s13, 0 }
 0x306   : > { %s5441_s3 = sand.u32 (!%p5925_p3), 1, %s4606_s2   ;;  %p5926_p0 = scmp.ne.s32.totalorder (!%p5925_p3), %s5897_s27, 0 }
 0x307   : > { %973 = sbr.rel (%p5925_p3) target bundleno = 4787 (0x12b3), region = 120  ;;  %s5444_s18 = sshll.u32 (!%p5925_p3), %s5441_s3, 3 }
 0x308   : > { %s976_s9 = scalar_lea.sflag (!%p5925_p3), [#allocation3], %s5441_s3  ;;  %s979_s10 = scalar_lea.vmem (!%p5925_p3), [#allocation2], %s5444_s18 }
 0x30e   : > { %4545 = dma.done.wait (%p5926_p0), %s976_s9, 128  }
 0x30f   : > { %4547 = vsyncadd (%p5926_p0), %s976_s9, 4294967168  ;;  %s5927_s0 = sld [smem:[#allocation59_spill]]  ;;  %s988_s4 = scalar_lea.vmem [#allocation5], %s5444_s18 }
 0x315   : > { %s984_s24 = sand.u32 1, %s5927_s0  }
 0x316   : > { %s985_s14 = scalar_lea.sflag [#allocation6], %s984_s24 }
 0x317   : > { %4549 = dma.done.wait (%p5926_p0), %s985_s14, 256  }
 0x318   : > { %4551 = vsyncadd (%p5926_p0), %s985_s14, 4294967040  ;;  %s997_s17 = scalar_lea.vmem [#allocation7], %s5444_s18  ;;  %p5928_p12 = scmp.eq.s32.totalorder %s5927_s0, 0 }
 0x31a   : > { %4553 = dma.done.wait (%p5928_p12), [#allocation9], 272   ;;  %p5929_p11 = pmov %p5928_p12 }
 0x31c   : > { %4555 = vsyncadd (%p5929_p11), [#allocation9], 4294967024  ;;  %p5930_p13 = pmov %p5929_p11 }
 0x31d   : > { %p5931_p4 = pmov %p5929_p11 }
 0x31e   : > { %4557 = dma.done.wait (%p5930_p13), [#allocation12], 272  }
 0x31f   : > { %4559 = vsyncadd (%p5931_p4), [#allocation12], 4294967024  ;;  %p5932_p7 = pmov %p5931_p4 }
 0x320   : > { %p5933_p8 = pmov %p5931_p4 }
 0x321   : > { %4561 = dma.done.wait (%p5932_p7), [#allocation15], 272  }
 0x322   : > { %4563 = vsyncadd (%p5933_p8), [#allocation15], 4294967024  ;;  %p5934_p6 = pmov %p5931_p4 }
 0x323   : > { %p5935_p5 = pmov %p5931_p4 }
 0x324   : > { %4565 = dma.done.wait (%p5934_p6), [#allocation18], 32  }
 0x325   : > { %4567 = vsyncadd (%p5935_p5), [#allocation18], 4294967264  ;;  %p5936_p2 = pmov %p5931_p4 }
 0x327   : > { %4569 = dma.done.wait (%p5936_p2), [#allocation21], 272   ;;  %p5937_p1 = pmov %p5936_p2 }
 0x329   : > { %4571 = vsyncadd (%p5937_p1), [#allocation21], 4294967024  ;;  %p5938_p9 = pmov %p5937_p1 }
 0x32a   : > { %p5939_p10 = pmov %p5937_p1 }
 0x32b   : > { %4573 = dma.done.wait (%p5938_p9), [#allocation24], 272  }
 0x32c   : > { %4575 = vsyncadd (%p5939_p10), [#allocation24], 4294967024  ;;  %p5940_p3 = pmov %p5937_p1 }
 0x32d   : > { %p5941_p0 = pmov %p5937_p1 }
 0x32e   : > { %4577 = dma.done.wait (%p5940_p3), [#allocation27], 272  }
 0x32f   : > { %4579 = vsyncadd (%p5941_p0), [#allocation27], 4294967024  ;;  %p5942_p12 = pmov %p5941_p0 }
 0x330   : > { %p5943_p11 = pmov %p5941_p0 }
 0x331   : > { %4581 = dma.done.wait (%p5942_p12), [#allocation30], 32  }
 0x332   : > { %4583 = vsyncadd (%p5943_p11), [#allocation30], 4294967264  ;;  %p5944_p13 = pmov %p5941_p0 }
 0x333   : > { %p5945_p4 = pmov %p5941_p0 }
 0x334   : > { %4585 = dma.done.wait (%p5944_p13), [#allocation33], 272  }
 0x335   : > { %4587 = vsyncadd (%p5945_p4), [#allocation33], 4294967024  ;;  %p5946_p7 = pmov %p5941_p0 }
 0x336   : > { %p5947_p8 = pmov %p5941_p0 }
 0x337   : > { %4589 = dma.done.wait (%p5946_p7), [#allocation36], 528  }
 0x338   : > { %4591 = vsyncadd (%p5947_p8), [#allocation36], 4294966768  ;;  %p5948_p6 = pmov %p5941_p0 }
 0x339   : > { %p5949_p5 = pmov %p5941_p0 }
 0x33a   : > { %4593 = dma.done.wait (%p5948_p6), [#allocation39], 32  }
 0x33b   : > { %4595 = vsyncadd (%p5949_p5), [#allocation39], 4294967264  ;;  %v4651_v0 = vmov 0.0   ;;  %vm4652_vm0 = vmmov 0   ;;  %v3729_v1 = vld [vmem:[#allocation11] sm:$0xff]   ;;  %v3730_v2 = vld [vmem:[#allocation8] sm:$0xff]  }
 0x33c   : > { %3266 = vmatprep.subr.bf16.mxu1 %v4651_v0  ;;  %3258 = vmatprep.subr.bf16.mxu0 %v4651_v0  ;;  %v3731_v3 = vld [vmem:[#allocation11 + $0x8] sm:$0xff]   ;;  %vm1192_vm1 = vcmask 261120   ;;  %v3732_v5 = vld [vmem:[#allocation8 + $0x8] sm:$0xff]   ;;  %v3142_v9 = vld [vmem:[#allocation13] ss:$0 sm:$0xff]  ;;  %vm1304_vm2 = vcmask 64512  }
 0x33d   : > { %3270 = vmatprep.mubr.msk.bf16.mxu1 %vm4652_vm0, %v4651_v0  ;;  %3262 = vmatprep.mubr.msk.bf16.mxu0 %vm4652_vm0, %v4651_v0  ;;  %v1165_v4 = vld [vmem:[%s988_s4] sm:$0xff]  ;;  %v5515_v6 = vld [vmem:[%s979_s10] sm:$0xff]  ;;  %s4653_s27 = smov 112   ;;  %s4654_s11 = smov 120   ;;  %vm1367_vm3 = vcmask 1043456   ;;  %vm1760_vm4 = vcmask 130048  }
 0x33e   : > { %3267 = vmatpush3.bf16.msra.mxu1 %v3729_v1  ;;  %3259 = vmatpush3.bf16.msra.mxu0 %v3730_v2  ;;  %v1166_v7 = vpack.c.bf16 %v1165_v4, %v1165_v4  ;;  %v1164_v8 = vpack.c.bf16 %v5515_v6, %v5515_v6  ;;  %v3138_v10 = vld [vmem:[#allocation10] ss:$0 sm:$0xff]  ;;  %s4655_s22 = smov 104   ;;  %s4656_s25 = smov 96   ;;  %vm1763_vm5 = vcmask 195584   ;;  %vm2656_vm6 = vcmask 523264  }
 0x33f   : > { %3268 = vmatprep.subr.bf16.mxu1 %v4651_v0  ;;  %3260 = vmatprep.subr.bf16.mxu0 %v4651_v0  ;;  %s4657_s30 = smov 80   ;;  %s4658_s23 = smov 72  }
 0x340   : > { %s4659_s7 = smov 88   ;;  %s4660_s28 = smov 8  }
 0x341   : > { %s4661_s15 = smov 16   ;;  %s4662_s21 = smov 24  }
 0x342   : > { %3269 = vmatpush3.bf16.msra.mxu1 %v3731_v3  ;;  %3261 = vmatpush3.bf16.msra.mxu0 %v3732_v5  ;;  %s5950_s8 = sld [smem:[#allocation56_spill]]  ;;  %s1161_s9 = scalar_lea.vmem [#allocation41], %s5444_s18 }
 0x343   : > { %3280 = vmatprep.subr.bf16.mxu1 %v4651_v0  ;;  %3274 = vmatprep.subr.bf16.mxu0 %v4651_v0  ;;  %s2746_s10 = sshll.u32 %s1161_s9, 4  ;;  %s5951_s14 = sld [smem:[#allocation88_spill]]  ;;  %s5717_s10 = int_to_ptr.vmem [resolvable:$true] %s2746_s10 }
 0x344   : > { %p5952_p1 = scmp.ne.s32.totalorder %s5898_s12, 0  ;;  %s4663_s18 = smov [#allocation41]  }
 0x345   : > { %3271 = vmatmul.mubr.msk.bf16.vlgmr.msra.gmra.mrb[0].mxu1 %vm1192_vm1, %v1166_v7  ;;  %3263 = vmatmul.mubr.msk.bf16.vlgmr.msra.gmra.mrb[0].mxu0 %vm1192_vm1, %v1164_v8 }
 0x346   : > { %3282 = vmatprep.mubr.msk.bf16.mxu1 %vm4652_vm0, %v4651_v0  ;;  %3276 = vmatprep.mubr.msk.bf16.mxu0 %vm4652_vm0, %v4651_v0 }
 0x348   : > { %s3196_s13 = sshll.u32 %s5950_s8, 7 }
 0x349   : > { %s5715_s4 = scalar_lea.hbm %s5951_s14, %s3196_s13 }
 0x418   : > { %v1297_v11 = vpop.f32.mrb[0].mxu1  ;;  %v1230_v14 = vpop.f32.mrb[0].mxu0 }
 0x419   : > { %v1298_v12 = vadd.f32 %v3142_v9, %v1297_v11  ;;  %v3272_v13 = vpop.f32.mrb[1].mxu1  ;;  %v1231_v16 = vadd.f32 %v3138_v10, %v1230_v14  ;;  %v3264_v17 = vpop.f32.mrb[1].mxu0 }
 0x41a   : > { %v1300_v15 = vpop.f32.mrb[2].mxu1  ;;  %v1233_v20 = vpop.f32.mrb[2].mxu0 }
 0x41b   : > { %v5527_v18 = vpack.c.bf16 %v1298_v12, %v1298_v12  ;;  %v3273_v19 = vpop.f32.mrb[3].mxu1  ;;  %v3265_v21 = vpop.f32.mrb[3].mxu0  ;;  %v1236_v22 = vpack.c.bf16 %v1231_v16, %v1231_v16 }
 0x41d   : > { %1528 = vrot.lane.b32.xlu1 %v5527_v18, %s4653_s27  ;;  %1417 = vrot.lane.b32.xlu0 %v5527_v18, %s4654_s11  ;;  %v1309_v23 = vsel %vm1304_vm2, %v5527_v18, 0 }
 0x41e   : > { %3275 = vmatpush3.bf16.xpose.msra.mxu0 %v1309_v23 }
 0x41f   : > { %3286 = vmatprep.subr.bf16.mxu0 %v4651_v0 }
 0x421   : > { %1526 = vrot.lane.b32.xlu1 %v1236_v22, %s4653_s27  ;;  %1415 = vrot.lane.b32.xlu0 %v1236_v22, %s4654_s11 }
 0x425   : > { %1637 = vrot.lane.b32.xlu1 %v1236_v22, %s4655_s22  ;;  %1639 = vrot.lane.b32.xlu0 %v5527_v18, %s4655_s22 }
 0x426   : > { %3277 = vmatmul.mubr.msk.bf16.vlgmr.msra.gmra.mrb[4].mxu0 %vm1304_vm2, %v1236_v22 }
 0x427   : > { %3288 = vmatprep.mubr.msk.bf16.mxu0 %vm4652_vm0, %v4651_v0 }
 0x429   : > { %1362 = vrot.lane.b32.xlu1 %v5527_v18, %s4656_s25 }
 0x48f   : > { %v1529_v24 = vpop.permute.xlu1 %1528  ;;  %v1418_v25 = vpop.permute.xlu0 %1417 }
 0x490   : > { %v1423_v26 = vsel %vm1304_vm2, %v1418_v25, 0  ;;  %v1534_v30 = vsel %vm1304_vm2, %v1529_v24, 0 }
 0x491   : > { %3287 = vmatpush3.bf16.xpose.msra.mxu0 %v1423_v26 }
 0x492   : > { %3298 = vmatprep.subr.bf16.mxu0 %v4651_v0 }
 0x493   : > { %v1527_v27 = vpop.permute.xlu1 %1526  ;;  %v1416_v28 = vpop.permute.xlu0 %1415 }
 0x497   : > { %v1638_v29 = vpop.permute.xlu1 %1637  ;;  %v1640_v33 = vpop.permute.xlu0 %1639 }
 0x498   : > { %3289 = vmatmul.mubr.msk.bf16.vlgmr.msra.gmra.mrb[8].mxu0 %vm1304_vm2, %v1416_v28  ;;  %v1645_v34 = vsel %vm1304_vm2, %v1640_v33, 0 }
 0x499   : > { %3299 = vmatpush3.bf16.xpose.msra.mxu0 %v1534_v30  ;;  %3300 = vmatprep.mubr.msk.bf16.mxu0 %vm4652_vm0, %v4651_v0 }
 0x49a   : > { %3310 = vmatprep.subr.bf16.mxu0 %v4651_v0 }
 0x49b   : > { %v1363_v31 = vpop.permute.xlu1 %1362 }
 0x49c   : > { %v1369_v32 = vsel %vm1367_vm3, %v1363_v31, 0  ;;  %v3733_v31 = vld [vmem:[#allocation14] sm:$0xff]  }
 0x49d   : > { %3281 = vmatpush3.bf16.msra.mxu1 %v1369_v32 }
 0x49e   : > { %3292 = vmatprep.subr.bf16.mxu1 %v4651_v0 }
 0x4a0   : > { %3301 = vmatmul.mubr.msk.bf16.vlgmr.msra.gmra.mrb[12].mxu0 %vm1304_vm2, %v1527_v27 }
 0x4a1   : > { %3311 = vmatpush3.bf16.xpose.msra.mxu0 %v1645_v34  ;;  %3312 = vmatprep.mubr.msk.bf16.mxu0 %vm4652_vm0, %v4651_v0 }
 0x4a2   : > { %3322 = vmatprep.subr.bf16.mxu0 %v4651_v0 }
 0x4a8   : > { %3313 = vmatmul.mubr.msk.bf16.vlgmr.msra.gmra.mrb[16].mxu0 %vm1304_vm2, %v1638_v29 }
 0x4a9   : > { %3326 = vmatprep.mubr.msk.bf16.mxu0 %vm4652_vm0, %v4651_v0  ;;  %3323 = vmatpush3.bf16.msra.mxu0 %v3733_v31 }
 0x4aa   : > { %3324 = vmatprep.subr.bf16.mxu0 %v4651_v0 }
 0x4f9   : > { %v1345_v35 = vpop.f32.mrb[4].mxu0 }
 0x4fa   : > { %v3278_v36 = vpop.f32.mrb[5].mxu0  ;;  %v1351_v37 = vsel %vm1304_vm2, %v1345_v35, -inf }
 0x4fb   : > { %1352 = vmax.xlane.f32.xlu0 %v1351_v37  ;;  %v1348_v38 = vpop.f32.mrb[6].mxu0 }
 0x4fc   : > { %v3279_v39 = vpop.f32.mrb[7].mxu0 }
 0x56b   : > { %v1459_v40 = vpop.f32.mrb[8].mxu0 }
 0x56c   : > { %v3290_v41 = vpop.f32.mrb[9].mxu0  ;;  %v1465_v42 = vsel %vm1304_vm2, %v1459_v40, -inf }
 0x56d   : > { %1466 = vmax.xlane.f32.xlu1 %v1465_v42  ;;  %v1462_v43 = vpop.f32.mrb[10].mxu0 }
 0x56e   : > { %v3291_v44 = vpop.f32.mrb[11].mxu0 }
 0x573   : > { %v1570_v45 = vpop.f32.mrb[12].mxu0 }
 0x574   : > { %v3302_v46 = vpop.f32.mrb[13].mxu0  ;;  %v1576_v47 = vsel %vm1304_vm2, %v1570_v45, -inf }
 0x575   : > { %1577 = vmax.xlane.f32.xlu0 %v1576_v47  ;;  %v1573_v48 = vpop.f32.mrb[14].mxu0 }
 0x576   : > { %v3303_v49 = vpop.f32.mrb[15].mxu0 }
 0x57b   : > { %v1681_v50 = vpop.f32.mrb[16].mxu0 }
 0x57c   : > { %v3314_v51 = vpop.f32.mrb[17].mxu0  ;;  %v1687_v52 = vsel %vm1304_vm2, %v1681_v50, -inf }
 0x57d   : > { %1688 = vmax.xlane.f32.xlu0 %v1687_v52  ;;  %v1684_v53 = vpop.f32.mrb[18].mxu0 }
 0x57e   : > { %1586 = vrot.lane.b32.xlu1 %v5527_v18, %s4657_s30  ;;  %v3315_v54 = vpop.f32.mrb[19].mxu0 }
 0x582   : > { %1697 = vrot.lane.b32.xlu1 %v5527_v18, %s4658_s23 }
 0x588   : > { %v1353_v55 = vpop.xlane.xlu0 %1352 }
 0x589   : > { %v1354_v56 = vsub.f32 %v1345_v35, %v1353_v55  ;;  %v3734_v35 = vld [vmem:[#allocation14 + $0x8] sm:$0xff]  }
 0x58a   : > { %3325 = vmatpush3.bf16.msra.mxu0 %v3734_v35 }
 0x58b   : > { %v1355_v57 = vmul.f32 1.442695, %v1354_v56  ;;  %3338 = vmatprep.subr.bf16.mxu0 %v4651_v0 }
 0x58d   : > { %3748 = vpow2.f32 %v1355_v57 }
 0x593   : > { %1475 = vrot.lane.b32.xlu0 %v5527_v18, %s4659_s7 }
 0x597   : > { %v3749_v58 = vpop.eup %3748 }
 0x598   : > { %v1360_v59 = vpack.c.bf16 %v3749_v58, %v3749_v58  ;;  %v1357_v21 = vsel %vm1304_vm2, %v3749_v58, 0.0 }
 0x59a   : > { %3283 = vmatmul.mubr.msk.bf16.vlgmr.msra.gmra.mrb[4].mxu1 %vm1304_vm2, %v1360_v59 }
 0x59b   : > { %3294 = vmatprep.mubr.msk.bf16.mxu1 %vm4652_vm0, %v4651_v0 }
 0x5fa   : > { %v1467_v60 = vpop.xlane.xlu1 %1466 }
 0x5fb   : > { %v1468_v61 = vsub.f32 %v1459_v40, %v1467_v60 }
 0x5fd   : > { %v1469_v62 = vmul.f32 1.442695, %v1468_v61 }
 0x5fe   : > { %v1587_v11 = vpop.permute.xlu1 %1586 }
 0x5ff   : > { %3750 = vpow2.f32 %v1469_v62  ;;  %v1592_v15 = vsel %vm1367_vm3, %v1587_v11, 0 }
 0x602   : > { %v1578_v63 = vpop.xlane.xlu0 %1577  ;;  %v1698_v16 = vpop.permute.xlu1 %1697 }
 0x603   : > { %v1579_v1 = vsub.f32 %v1570_v45, %v1578_v63  ;;  %v1703_v20 = vsel %vm1367_vm3, %v1698_v16, 0  ;;  %v3154_v63 = vld [vmem:[#allocation16] ss:$0 sm:$0xff] }
 0x604   : > { %v3737_v16 = vld [vmem:[%s997_s17] sm:$0xff]   ;;  %s2732_s17 = scalar_lea.sflag [#allocation4], %s5441_s3 }
 0x605   : > { %v1580_v2 = vmul.f32 1.442695, %v1579_v1 }
 0x607   : > { %3752 = vpow2.f32 %v1580_v2 }
 0x609   : > { %v3751_v3 = vpop.eup %3750 }
 0x60a   : > { %v1689_v4 = vpop.xlane.xlu0 %1688  ;;  %v1471_v5 = vsel %vm1304_vm2, %v3751_v3, 0.0  ;;  %v1474_v13 = vpack.c.bf16 %v3751_v3, %v3751_v3 }
 0x60b   : > { %v1690_v7 = vsub.f32 %v1681_v50, %v1689_v4  ;;  %1472 = vadd.xlane.f32.xlu0 %v1471_v5 }
 0x60d   : > { %v1691_v8 = vmul.f32 1.442695, %v1690_v7 }
 0x60e   : > { %v1476_v9 = vpop.permute.xlu0 %1475 }
 0x60f   : > { %3754 = vpow2.f32 %v1691_v8  ;;  %v1481_v10 = vsel %vm1367_vm3, %v1476_v9, 0 }
 0x610   : > { %3293 = vmatpush3.bf16.msra.mxu1 %v1481_v10 }
 0x611   : > { %v3753_v12 = vpop.eup %3752  ;;  %3304 = vmatprep.subr.bf16.mxu1 %v4651_v0 }
 0x612   : > { %v1582_v14 = vsel %vm1304_vm2, %v3753_v12, 0.0  ;;  %v1585_v18 = vpack.c.bf16 %v3753_v12, %v3753_v12 }
 0x613   : > { %1583 = vadd.xlane.f32.xlu1 %v1582_v14  ;;  %3295 = vmatmul.mubr.msk.bf16.vlgmr.msra.gmra.mrb[8].mxu1 %vm1304_vm2, %v1474_v13  ;;  %v3735_v14 = vld [vmem:[#allocation23] sm:$0xff]  }
 0x614   : > { %3305 = vmatpush3.bf16.msra.mxu1 %v1592_v15  ;;  %3306 = vmatprep.mubr.msk.bf16.mxu1 %vm4652_vm0, %v4651_v0  ;;  %v3736_v15 = vld [vmem:[#allocation23 + $0x8] sm:$0xff]  }
 0x615   : > { %3316 = vmatprep.subr.bf16.mxu1 %v4651_v0 }
 0x619   : > { %v3755_v17 = vpop.eup %3754 }
 0x61a   : > { %v1693_v19 = vsel %vm1304_vm2, %v3755_v17, 0.0  ;;  %v1696_v22 = vpack.c.bf16 %v3755_v17, %v3755_v17  ;;  %v3739_v17 = vld [vmem:[#allocation20 + $0x8] sm:$0xff]  }
 0x61b   : > { %1694 = vadd.xlane.f32.xlu0 %v1693_v19  ;;  %3307 = vmatmul.mubr.msk.bf16.vlgmr.msra.gmra.mrb[12].mxu1 %vm1304_vm2, %v1585_v18 }
 0x61c   : > { %3317 = vmatpush3.bf16.msra.mxu1 %v1703_v20  ;;  %3318 = vmatprep.mubr.msk.bf16.mxu1 %vm4652_vm0, %v4651_v0 }
 0x61d   : > { %3330 = vmatprep.subr.bf16.mxu1 %v4651_v0 }
 0x61f   : > { %1358 = vadd.xlane.f32.xlu0 %v1357_v21 }
 0x623   : > { %3319 = vmatmul.mubr.msk.bf16.vlgmr.msra.gmra.mrb[16].mxu1 %vm1304_vm2, %v1696_v22  ;;  %v3158_v22 = vld [vmem:[#allocation17] ss:$0 sm:$0xff] }
 0x624   : > { %3334 = vmatprep.mubr.msk.bf16.mxu1 %vm4652_vm0, %v4651_v0 }
 0x66d   : > { %v1405_v23 = vpop.f32.mrb[4].mxu1 }
 0x66e   : > { %v3284_v24 = vpop.f32.mrb[5].mxu1 }
 0x66f   : > { %v1408_v25 = vpop.f32.mrb[6].mxu1  ;;  %v3159_v24 = vld [vmem:[#allocation19] ss:$0 sm:$0xff] }
 0x670   : > { %v3285_v26 = vpop.f32.mrb[7].mxu1 }
 0x698   : > { %v1473_v27 = vpop.xlane.xlu0 %1472 }
 0x699   : > { %3756 = vrcp.f32 %v1473_v27 }
 0x6a0   : > { %v1584_v28 = vpop.xlane.xlu1 %1583 }
 0x6a1   : > { %3758 = vrcp.f32 %v1584_v28  ;;  %v3164_v28 = vld [vmem:[#allocation25] ss:$0 sm:$0xff] }
 0x6a3   : > { %v3757_v29 = vpop.eup %3756 }
 0x6a8   : > { %v1695_v36 = vpop.xlane.xlu0 %1694 }
 0x6a9   : > { %3760 = vrcp.f32 %v1695_v36 }
 0x6ab   : > { %v3759_v39 = vpop.eup %3758 }
 0x6ac   : > { %v1359_v53 = vpop.xlane.xlu0 %1358 }
 0x6ad   : > { %3762 = vrcp.f32 %v1359_v53 }
 0x6b3   : > { %v3761_v46 = vpop.eup %3760 }
 0x6b7   : > { %v3763_v54 = vpop.eup %3762 }
 0x6b8   : > { %v1412_v55 = vmul.f32 %v3763_v54, %v1405_v23 }
 0x6ba   : > { %v1413_v57 = vpack.c.bf16 %v1412_v55, %v1412_v55 }
 0x6e6   : > { %v1517_v30 = vpop.f32.mrb[8].mxu1 }
 0x6e7   : > { %v1524_v32 = vmul.f32 %v3757_v29, %v1517_v30  ;;  %v3296_v33 = vpop.f32.mrb[9].mxu1 }
 0x6e8   : > { %v1520_v34 = vpop.f32.mrb[10].mxu1 }
 0x6e9   : > { %v1525_v37 = vpack.c.bf16 %v1524_v32, %v1524_v32  ;;  %v3297_v38 = vpop.f32.mrb[11].mxu1 }
 0x6eb   : > { %1749 = vrot.lane.b32.xlu1 %v1525_v37, %s4660_s28  ;;  %v3160_v37 = vld [vmem:[#allocation22] ss:$0 sm:$0xff] }
 0x6ee   : > { %v1628_v40 = vpop.f32.mrb[12].mxu1 }
 0x6ef   : > { %v1635_v41 = vmul.f32 %v3759_v39, %v1628_v40  ;;  %v3308_v42 = vpop.f32.mrb[13].mxu1 }
 0x6f0   : > { %v1631_v43 = vpop.f32.mrb[14].mxu1 }
 0x6f1   : > { %v1636_v44 = vpack.c.bf16 %v1635_v41, %v1635_v41  ;;  %v3309_v45 = vpop.f32.mrb[15].mxu1 }
 0x6f3   : > { %1752 = vrot.lane.b32.xlu0 %v1636_v44, %s4661_s15 }
 0x6f6   : > { %v1739_v47 = vpop.f32.mrb[16].mxu1 }
 0x6f7   : > { %v1746_v48 = vmul.f32 %v3761_v46, %v1739_v47  ;;  %v3320_v49 = vpop.f32.mrb[17].mxu1 }
 0x6f8   : > { %v1742_v50 = vpop.f32.mrb[18].mxu1 }
 0x6f9   : > { %v1747_v51 = vpack.c.bf16 %v1746_v48, %v1746_v48  ;;  %v3321_v52 = vpop.f32.mrb[19].mxu1 }
 0x6fb   : > { %1755 = vrot.lane.b32.xlu1 %v1747_v51, %s4662_s21 }
 0x75d   : > { %v1750_v56 = vpop.permute.xlu1 %1749 }
 0x75e   : > { %v1759_v59 = vsel %vm1304_vm2, %v1413_v57, %v1750_v56 }
 0x765   : > { %v1753_v58 = vpop.permute.xlu0 %1752 }
 0x766   : > { %v1762_v60 = vsel %vm1760_vm4, %v1759_v59, %v1753_v58 }
 0x76d   : > { %v1756_v61 = vpop.permute.xlu1 %1755 }
 0x76e   : > { %v1765_v62 = vsel %vm1763_vm5, %v1762_v60, %v1756_v61 }
 0x76f   : > { %3327 = vmatmul.mubr.msk.bf16.vlgmr.msra.gmra.mrb[20].mxu0 %vm1192_vm1, %v1765_v62 }
 0x770   : > { %3342 = vmatprep.mubr.msk.bf16.mxu0 %vm4652_vm0, %v4651_v0  ;;  %3339 = vmatpush3.bf16.msra.mxu0 %v3735_v14 }
 0x771   : > { %3340 = vmatprep.subr.bf16.mxu0 %v4651_v0 }
 0x774   : > { %3341 = vmatpush3.bf16.msra.mxu0 %v3736_v15 }
 0x775   : > { %3352 = vmatprep.subr.bf16.mxu0 %v4651_v0 }
 0x777   : > { %3343 = vmatmul.mubr.msk.bf16.vlgmr.msra.gmra.mrb[24].mxu0 %vm1192_vm1, %v3737_v16 }
 0x778   : > { %3354 = vmatprep.mubr.msk.bf16.mxu0 %vm4652_vm0, %v4651_v0 }
 0x842   : > { %v1825_v1 = vpop.f32.mrb[20].mxu0 }
 0x843   : > { %v1826_v2 = vadd.f32 %v3154_v63, %v1825_v1  ;;  %v3328_v3 = vpop.f32.mrb[21].mxu0 }
 0x844   : > { %v1828_v4 = vpop.f32.mrb[22].mxu0 }
 0x845   : > { %v3329_v5 = vpop.f32.mrb[23].mxu0  ;;  %v1831_v7 = vadd.f32 %v1826_v2, %v5515_v6  ;;  %v3738_v6 = vld [vmem:[#allocation20] sm:$0xff]  }
 0x846   : > { %3331 = vmatpush3.bf16.msra.mxu1 %v3738_v6 }
 0x847   : > { %v1832_v8 = vsel %vm1192_vm1, %v1831_v7, 0.0  ;;  %3332 = vmatprep.subr.bf16.mxu1 %v4651_v0 }
 0x848   : > { %1833 = vadd.xlane.f32.xlu1 %v1832_v8 }
 0x84a   : > { %3333 = vmatpush3.bf16.msra.mxu1 %v3739_v17  ;;  %v1995_v29 = vpop.f32.mrb[24].mxu0 }
 0x84b   : > { %3346 = vmatprep.subr.bf16.mxu1 %v4651_v0  ;;  %v1996_v30 = vadd.f32 %v3164_v28, %v1995_v29  ;;  %v3344_v31 = vpop.f32.mrb[25].mxu0 }
 0x84c   : > { %v1998_v32 = vpop.f32.mrb[26].mxu0 }
 0x84d   : > { %v1999_v33 = vadd.f32 %v3164_v28, %v1998_v32  ;;  %v3345_v34 = vpop.f32.mrb[27].mxu0 }
 0x84f   : > { %v5625_v35 = vpack.c.bf16 %v1999_v33, %v1996_v30 }
 0x851   : > { %v2007_v36 = vsel %vm1304_vm2, %v5625_v35, 0 }
 0x8d5   : > { %v1834_v9 = vpop.xlane.xlu1 %1833 }
 0x8d6   : > { %v1836_v10 = vmul.f32 0.03125, %v1834_v9 }
 0x8d8   : > { %v1837_v11 = vsub.f32 %v1831_v7, %v1836_v10 }
 0x8da   : > { %v1838_v12 = vmul.f32 %v1837_v11, %v1837_v11 }
 0x8dc   : > { %v1839_v13 = vsel %vm1192_vm1, %v1838_v12, 0.0 }
 0x8dd   : > { %1840 = vadd.xlane.f32.xlu0 %v1839_v13 }
 0x8f3   : > { %2112 = vrot.lane.b32.xlu0 %v5625_v35, %s4654_s11 }
 0x96a   : > { %v1841_v18 = vpop.xlane.xlu0 %1840 }
 0x96b   : > { %v1842_v19 = vmul.f32 0.03125, %v1841_v18 }
 0x96d   : > { %v1843_v20 = vadd.f32 1e-05, %v1842_v19 }
 0x96e   : > { %v2113_v41 = vpop.permute.xlu0 %2112 }
 0x96f   : > { %3764 = vrsqrt.f32 %v1843_v20  ;;  %v2118_v45 = vsel %vm1304_vm2, %v2113_v41, 0 }
 0x979   : > { %v3765_v21 = vpop.eup %3764 }
 0x97a   : > { %v1845_v23 = vmul.f32 %v3765_v21, %v1837_v11 }
 0x97c   : > { %v1853_v25 = vmul.f32 %v3158_v22, %v1845_v23 }
 0x97e   : > { %v5618_v26 = vadd.f32 %v3159_v24, %v1853_v25 }
 0x980   : > { %v1862_v27 = vpack.c.bf16 %v5618_v26, %v5618_v26 }
 0x982   : > { %3335 = vmatmul.mubr.msk.bf16.vlgmr.msra.gmra.mrb[20].mxu1 %vm1192_vm1, %v1862_v27 }
 0x983   : > { %3348 = vmatprep.mubr.msk.bf16.mxu1 %vm4652_vm0, %v4651_v0  ;;  %3347 = vmatpush3.bf16.xpose.msra.mxu1 %v2007_v36 }
 0x984   : > { %3358 = vmatprep.subr.bf16.mxu1 %v4651_v0 }
 0xa55   : > { %v1923_v38 = vpop.f32.mrb[20].mxu1 }
 0xa56   : > { %v1924_v39 = vadd.f32 %v3160_v37, %v1923_v38  ;;  %v3336_v40 = vpop.f32.mrb[21].mxu1 }
 0xa57   : > { %v1926_v42 = vpop.f32.mrb[22].mxu1 }
 0xa58   : > { %v1929_v43 = vpack.c.bf16 %v1924_v39, %v1924_v39  ;;  %v3337_v44 = vpop.f32.mrb[23].mxu1 }
 0xa5a   : > { %2110 = vrot.lane.b32.xlu1 %v1929_v43, %s4654_s11  ;;  %2219 = vrot.lane.b32.xlu0 %v1929_v43, %s4653_s27  ;;  %s4496_s11 = sshll.u32 %s4663_s18, 4  ;;  %s4497_s11 = int_to_ptr.vmem [resolvable:$false] %s4496_s11 }
 0xa5b   : > { %3349 = vmatmul.mubr.msk.bf16.vlgmr.msra.gmra.mrb[24].mxu1 %vm1304_vm2, %v1929_v43  ;;  %p4499_p3 = scmp.lt.s32.totalorder %s5717_s10, %s4497_s11 }
 0xa5c   : > { %3359 = vmatpush3.bf16.xpose.msra.mxu1 %v2118_v45  ;;  %3360 = vmatprep.mubr.msk.bf16.mxu1 %vm4652_vm0, %v4651_v0 }
 0xa5d   : > { %3370 = vmatprep.subr.bf16.mxu1 %v4651_v0 }
 0xa5e   : > { %2221 = vrot.lane.b32.xlu1 %v5625_v35, %s4653_s27  ;;  %2328 = vrot.lane.b32.xlu0 %v1929_v43, %s4655_s22  ;;  %s4492_s27 = scalar_lea.vmem %s5717_s10, 128 }
 0xa5f   : > { %p4493_p2 = scmp.ne.s32.totalorder %s5717_s10, %s4492_s27 }
 0xa61   : > { %p4494_p9 = pnand %p4493_p2, %p5952_p1 }
 0xa62   : > { %2330 = vrot.lane.b32.xlu1 %v5625_v35, %s4655_s22  ;;  %s4498_s22 = scalar_lea.vmem %s4497_s11, 256 }
 0xa63   : > { %p4495_p10 = pneg %p4494_p9  ;;  %p4500_p0 = scmp.lt.s32.totalorder %s4498_s22, %s4492_s27 }
 0xa65   : > { %p4501_p12 = por %p4500_p0, %p4499_p3 }
 0xa67   : > { %p4502_p11 = pnand %p4501_p12, %p4495_p10 }
 0xacc   : > { %v2111_v46 = vpop.permute.xlu1 %2110  ;;  %v2220_v50 = vpop.permute.xlu0 %2219 }
 0xacd   : > { %3361 = vmatmul.mubr.msk.bf16.vlgmr.msra.gmra.mrb[28].mxu1 %vm1304_vm2, %v2111_v46 }
 0xace   : > { %3372 = vmatprep.mubr.msk.bf16.mxu1 %vm4652_vm0, %v4651_v0 }
 0xad0   : > { %v2222_v47 = vpop.permute.xlu1 %2221  ;;  %v2329_v52 = vpop.permute.xlu0 %2328 }
 0xad1   : > { %v2227_v48 = vsel %vm1304_vm2, %v2222_v47, 0  ;;  %v3740_v47 = vld [vmem:[#allocation26] sm:$0xff]  }
 0xad2   : > { %3371 = vmatpush3.bf16.xpose.msra.mxu1 %v2227_v48 }
 0xad3   : > { %3382 = vmatprep.subr.bf16.mxu1 %v4651_v0 }
 0xad4   : > { %v2331_v49 = vpop.permute.xlu1 %2330 }
 0xad5   : > { %v2336_v51 = vsel %vm1304_vm2, %v2331_v49, 0 }
 0xad9   : > { %3373 = vmatmul.mubr.msk.bf16.vlgmr.msra.gmra.mrb[32].mxu1 %vm1304_vm2, %v2220_v50 }
 0xada   : > { %3383 = vmatpush3.bf16.xpose.msra.mxu1 %v2336_v51  ;;  %3384 = vmatprep.mubr.msk.bf16.mxu1 %vm4652_vm0, %v4651_v0  ;;  %v3741_v51 = vld [vmem:[#allocation26 + $0x8] sm:$0xff]  }
 0xadb   : > { %3394 = vmatprep.subr.bf16.mxu1 %v4651_v0 }
 0xae1   : > { %3385 = vmatmul.mubr.msk.bf16.vlgmr.msra.gmra.mrb[36].mxu1 %vm1304_vm2, %v2329_v52 }
 0xae2   : > { %3398 = vmatprep.mubr.msk.bf16.mxu1 %vm4652_vm0, %v4651_v0  ;;  %3395 = vmatpush3.bf16.msra.mxu1 %v3740_v47 }
 0xae3   : > { %3396 = vmatprep.subr.bf16.mxu1 %v4651_v0 }
 0xae6   : > { %3397 = vmatpush3.bf16.msra.mxu1 %v3741_v51 }
 0xae7   : > { %3410 = vmatprep.subr.bf16.mxu1 %v4651_v0 }
 0xb2e   : > { %v2043_v53 = vpop.f32.mrb[24].mxu1 }
 0xb2f   : > { %v3350_v54 = vpop.f32.mrb[25].mxu1  ;;  %v2049_v55 = vsel %vm1760_vm4, %v2043_v53, -inf }
 0xb30   : > { %2050 = vmax.xlane.f32.xlu1 %v2049_v55  ;;  %v2046_v56 = vpop.f32.mrb[26].mxu1 }
 0xb31   : > { %v3351_v57 = vpop.f32.mrb[27].mxu1 }
 0xb41   : > { %2170 = vrot.lane.b32.xlu1 %v5625_v35, %s4659_s7 }
 0xba0   : > { %v2154_v58 = vpop.f32.mrb[28].mxu1 }
 0xba1   : > { %v3362_v59 = vpop.f32.mrb[29].mxu1  ;;  %v2160_v60 = vsel %vm1760_vm4, %v2154_v58, -inf }
 0xba2   : > { %2161 = vmax.xlane.f32.xlu0 %v2160_v60  ;;  %v2157_v61 = vpop.f32.mrb[30].mxu1 }
 0xba3   : > { %v3363_v62 = vpop.f32.mrb[31].mxu1 }
 0xbac   : > { %v2263_v63 = vpop.f32.mrb[32].mxu1 }
 0xbad   : > { %v3374_v1 = vpop.f32.mrb[33].mxu1  ;;  %v2269_v2 = vsel %vm1760_vm4, %v2263_v63, -inf }
 0xbae   : > { %2270 = vmax.xlane.f32.xlu0 %v2269_v2  ;;  %v2266_v3 = vpop.f32.mrb[34].mxu1 }
 0xbaf   : > { %v3375_v4 = vpop.f32.mrb[35].mxu1 }
 0xbb4   : > { %v2372_v5 = vpop.f32.mrb[36].mxu1 }
 0xbb5   : > { %v3386_v7 = vpop.f32.mrb[37].mxu1  ;;  %v2378_v8 = vsel %vm1760_vm4, %v2372_v5, -inf }
 0xbb6   : > { %2379 = vmax.xlane.f32.xlu1 %v2378_v8  ;;  %v2375_v9 = vpop.f32.mrb[38].mxu1 }
 0xbb7   : > { %v3387_v10 = vpop.f32.mrb[39].mxu1 }
 0xbbd   : > { %v2051_v11 = vpop.xlane.xlu1 %2050 }
 0xbbe   : > { %v2052_v12 = vsub.f32 %v2043_v53, %v2051_v11 }
 0xbc0   : > { %v2053_v13 = vmul.f32 1.442695, %v2052_v12 }
 0xbc1   : > { %v2171_v21 = vpop.permute.xlu1 %2170 }
 0xbc2   : > { %3766 = vpow2.f32 %v2053_v13 }
 0xbc4   : > { %2060 = vrot.lane.b32.xlu0 %v5625_v35, %s4656_s25 }
 0xbc7   : > { %2279 = vrot.lane.b32.xlu1 %v5625_v35, %s4657_s30 }
 0xbc8   : > { %2388 = vrot.lane.b32.xlu0 %v5625_v35, %s4658_s23 }
 0xbcc   : > { %v3767_v18 = vpop.eup %3766 }
 0xbcd   : > { %v2058_v24 = vpack.c.bf16 %v3767_v18, %v3767_v18  ;;  %v2055_v27 = vsel %vm1760_vm4, %v3767_v18, 0.0 }
 0xc2f   : > { %v2162_v14 = vpop.xlane.xlu0 %2161 }
 0xc30   : > { %v2163_v15 = vsub.f32 %v2154_v58, %v2162_v14 }
 0xc32   : > { %v2164_v16 = vmul.f32 1.442695, %v2163_v15 }
 0xc34   : > { %3768 = vpow2.f32 %v2164_v16 }
 0xc3b   : > { %v2271_v6 = vpop.xlane.xlu0 %2270 }
 0xc3c   : > { %v2272_v17 = vsub.f32 %v2263_v63, %v2271_v6  ;;  %v3177_v6 = vld [vmem:[#allocation28] ss:$0 sm:$0xff] }
 0xc3e   : > { %v3769_v19 = vpop.eup %3768  ;;  %v2273_v20 = vmul.f32 1.442695, %v2272_v17 }
 0xc3f   : > { %v2061_v22 = vpop.permute.xlu0 %2060  ;;  %v2166_v23 = vsel %vm1760_vm4, %v3769_v19, 0.0  ;;  %v2169_v30 = vpack.c.bf16 %v3769_v19, %v3769_v19 }
 0xc40   : > { %3770 = vpow2.f32 %v2273_v20  ;;  %3353 = vmatpush3.bf16.msra.mxu0 %v2061_v22  ;;  %2167 = vadd.xlane.f32.xlu1 %v2166_v23 }
 0xc41   : > { %3364 = vmatprep.subr.bf16.mxu0 %v4651_v0 }
 0xc43   : > { %3355 = vmatmul.mubr.msk.bf16.vlgmr.msra.gmra.mrb[28].mxu0 %vm1760_vm4, %v2058_v24  ;;  %v2380_v25 = vpop.xlane.xlu1 %2379  ;;  %v2389_v36 = vpop.permute.xlu0 %2388 }
 0xc44   : > { %v2381_v28 = vsub.f32 %v2372_v5, %v2380_v25  ;;  %3365 = vmatpush3.bf16.msra.mxu0 %v2171_v21  ;;  %2056 = vadd.xlane.f32.xlu1 %v2055_v27 }
 0xc45   : > { %3366 = vmatprep.mubr.msk.bf16.mxu0 %vm4652_vm0, %v4651_v0  ;;  %3376 = vmatprep.subr.bf16.mxu0 %v4651_v0 }
 0xc46   : > { %v2382_v29 = vmul.f32 1.442695, %v2381_v28 }
 0xc47   : > { %v2280_v32 = vpop.permute.xlu1 %2279 }
 0xc48   : > { %3772 = vpow2.f32 %v2382_v29 }
 0xc4a   : > { %v3771_v31 = vpop.eup %3770 }
 0xc4b   : > { %3367 = vmatmul.mubr.msk.bf16.vlgmr.msra.gmra.mrb[32].mxu0 %vm1760_vm4, %v2169_v30  ;;  %v2275_v33 = vsel %vm1760_vm4, %v3771_v31, 0.0  ;;  %v2278_v34 = vpack.c.bf16 %v3771_v31, %v3771_v31  ;;  %v3742_v30 = vld [vmem:[#allocation32] sm:$0xff]   ;;  %v3743_v31 = vld [vmem:[#allocation32 + $0x8] sm:$0xff]  }
 0xc4c   : > { %3377 = vmatpush3.bf16.msra.mxu0 %v2280_v32  ;;  %2276 = vadd.xlane.f32.xlu0 %v2275_v33  ;;  %v3744_v32 = vld [vmem:[#allocation35] sm:$0xff]   ;;  %v3745_v33 = vld [vmem:[#allocation35 + $0x8] sm:$0xff]  }
 0xc4d   : > { %3378 = vmatprep.mubr.msk.bf16.mxu0 %vm4652_vm0, %v4651_v0  ;;  %3388 = vmatprep.subr.bf16.mxu0 %v4651_v0 }
 0xc52   : > { %v3773_v35 = vpop.eup %3772 }
 0xc53   : > { %3379 = vmatmul.mubr.msk.bf16.vlgmr.msra.gmra.mrb[36].mxu0 %vm1760_vm4, %v2278_v34  ;;  %v2384_v37 = vsel %vm1760_vm4, %v3773_v35, 0.0  ;;  %v2387_v38 = vpack.c.bf16 %v3773_v35, %v3773_v35 }
 0xc54   : > { %3389 = vmatpush3.bf16.msra.mxu0 %v2389_v36  ;;  %2385 = vadd.xlane.f32.xlu0 %v2384_v37  ;;  %v3181_v37 = vld [vmem:[#allocation29] ss:$0 sm:$0xff] }
 0xc55   : > { %3390 = vmatprep.mubr.msk.bf16.mxu0 %vm4652_vm0, %v4651_v0  ;;  %3402 = vmatprep.subr.bf16.mxu0 %v4651_v0 }
 0xc5b   : > { %3391 = vmatmul.mubr.msk.bf16.vlgmr.msra.gmra.mrb[40].mxu0 %vm1760_vm4, %v2387_v38 }
 0xc5c   : > { %3406 = vmatprep.mubr.msk.bf16.mxu0 %vm4652_vm0, %v4651_v0  ;;  %3403 = vmatpush3.bf16.msra.mxu0 %v3742_v30 }
 0xc5d   : > { %3404 = vmatprep.subr.bf16.mxu0 %v4651_v0 }
 0xc60   : > { %3405 = vmatpush3.bf16.msra.mxu0 %v3743_v31 }
 0xccd   : > { %v2168_v39 = vpop.xlane.xlu1 %2167 }
 0xcce   : > { %3774 = vrcp.f32 %v2168_v39  ;;  %v3182_v39 = vld [vmem:[#allocation31] ss:$0 sm:$0xff] }
 0xcd1   : > { %v2057_v7 = vpop.xlane.xlu1 %2056 }
 0xcd8   : > { %v3775_v45 = vpop.eup %3774 }
 0xcd9   : > { %v2277_v43 = vpop.xlane.xlu0 %2276 }
 0xcda   : > { %3776 = vrcp.f32 %v2277_v43  ;;  %v3746_v43 = vld [vmem:[#allocation35 + $0x10] sm:$0xff]  }
 0xce1   : > { %v2386_v52 = vpop.xlane.xlu0 %2385 }
 0xce2   : > { %3778 = vrcp.f32 %v2386_v52 }
 0xce3   : > { %3780 = vrcp.f32 %v2057_v7  ;;  %v3193_v7 = vld [vmem:[#allocation38] ss:$0 sm:$0xff] }
 0xce4   : > { %v3777_v55 = vpop.eup %3776 }
 0xcec   : > { %v3779_v62 = vpop.eup %3778 }
 0xced   : > { %v3781_v8 = vpop.eup %3780 }
 0xd16   : > { %v2100_v40 = vpop.f32.mrb[28].mxu0 }
 0xd17   : > { %v3356_v41 = vpop.f32.mrb[29].mxu0  ;;  %v2107_v9 = vmul.f32 %v3781_v8, %v2100_v40 }
 0xd18   : > { %v2103_v42 = vpop.f32.mrb[30].mxu0 }
 0xd19   : > { %v3357_v44 = vpop.f32.mrb[31].mxu0  ;;  %v2108_v12 = vpack.c.bf16 %v2107_v9, %v2107_v9  ;;  %v3194_v9 = vld [vmem:[#allocation40] ss:$0 sm:$0xff] }
 0xd1a   : > { %v3747_v44 = vld [vmem:[#allocation35 + $0x18] sm:$0xff]  }
 0xd1e   : > { %v2210_v46 = vpop.f32.mrb[32].mxu0 }
 0xd1f   : > { %v2217_v48 = vmul.f32 %v3775_v45, %v2210_v46  ;;  %v3368_v49 = vpop.f32.mrb[33].mxu0  ;;  %v3183_v45 = vld [vmem:[#allocation34] ss:$0 sm:$0xff] }
 0xd20   : > { %v2213_v50 = vpop.f32.mrb[34].mxu0 }
 0xd21   : > { %v2218_v53 = vpack.c.bf16 %v2217_v48, %v2217_v48  ;;  %v3369_v54 = vpop.f32.mrb[35].mxu0 }
 0xd23   : > { %2438 = vrot.lane.b32.xlu0 %v2218_v53, %s4660_s28  ;;  %v3187_v53 = vld [vmem:[#allocation37] ss:$0 sm:$0xff] }
 0xd26   : > { %v2319_v56 = vpop.f32.mrb[36].mxu0 }
 0xd27   : > { %v2326_v57 = vmul.f32 %v3777_v55, %v2319_v56  ;;  %v3380_v58 = vpop.f32.mrb[37].mxu0 }
 0xd28   : > { %v2322_v59 = vpop.f32.mrb[38].mxu0 }
 0xd29   : > { %v2327_v60 = vpack.c.bf16 %v2326_v57, %v2326_v57  ;;  %v3381_v61 = vpop.f32.mrb[39].mxu0 }
 0xd2b   : > { %2441 = vrot.lane.b32.xlu1 %v2327_v60, %s4661_s15 }
 0xd2e   : > { %v2428_v63 = vpop.f32.mrb[40].mxu0 }
 0xd2f   : > { %v2435_v1 = vmul.f32 %v3779_v62, %v2428_v63  ;;  %v3392_v2 = vpop.f32.mrb[41].mxu0 }
 0xd30   : > { %v2431_v3 = vpop.f32.mrb[42].mxu0 }
 0xd31   : > { %v2436_v4 = vpack.c.bf16 %v2435_v1, %v2435_v1  ;;  %v3393_v5 = vpop.f32.mrb[43].mxu0 }
 0xd33   : > { %2444 = vrot.lane.b32.xlu1 %v2436_v4, %s4662_s21 }
 0xd95   : > { %v2439_v10 = vpop.permute.xlu0 %2438 }
 0xd96   : > { %v2448_v13 = vsel %vm1304_vm2, %v2108_v12, %v2439_v10 }
 0xd9d   : > { %v2442_v11 = vpop.permute.xlu1 %2441 }
 0xd9e   : > { %v2450_v14 = vsel %vm1760_vm4, %v2448_v13, %v2442_v11 }
 0xda5   : > { %v2445_v15 = vpop.permute.xlu1 %2444 }
 0xda6   : > { %v2452_v16 = vsel %vm1763_vm5, %v2450_v14, %v2445_v15 }
 0xda7   : > { %3399 = vmatmul.mubr.msk.bf16.vlgmr.msra.gmra.mrb[40].mxu1 %vm1192_vm1, %v2452_v16 }
 0xda8   : > { %3418 = vmatprep.mubr.msk.bf16.mxu1 %vm4652_vm0, %v4651_v0  ;;  %3411 = vmatpush3.bf16.msra.mxu1 %v3744_v32 }
 0xda9   : > { %3412 = vmatprep.subr.bf16.mxu1 %v4651_v0 }
 0xdac   : > { %3413 = vmatpush3.bf16.msra.mxu1 %v3745_v33 }
 0xdad   : > { %3414 = vmatprep.subr.bf16.mxu1 %v4651_v0 }
 0xdb0   : > { %3415 = vmatpush3.bf16.msra.mxu1 %v3746_v43 }
 0xdb1   : > { %3416 = vmatprep.subr.bf16.mxu1 %v4651_v0 }
 0xdb4   : > { %3417 = vmatpush3.bf16.msra.mxu1 %v3747_v44 }
 0xe7a   : > { %v2512_v17 = vpop.f32.mrb[40].mxu1 }
 0xe7b   : > { %v2513_v18 = vadd.f32 %v3177_v6, %v2512_v17  ;;  %v3400_v19 = vpop.f32.mrb[41].mxu1 }
 0xe7c   : > { %v2515_v20 = vpop.f32.mrb[42].mxu1 }
 0xe7d   : > { %v3401_v21 = vpop.f32.mrb[43].mxu1  ;;  %v2518_v22 = vadd.f32 %v2513_v18, %v5618_v26 }
 0xe7f   : > { %v2519_v23 = vsel %vm1192_vm1, %v2518_v22, 0.0 }
 0xe80   : > { %2520 = vadd.xlane.f32.xlu0 %v2519_v23 }
 0xf0d   : > { %v2521_v24 = vpop.xlane.xlu0 %2520 }
 0xf0e   : > { %v2522_v25 = vmul.f32 0.03125, %v2521_v24 }
 0xf10   : > { %v2523_v27 = vsub.f32 %v2518_v22, %v2522_v25 }
 0xf12   : > { %v2524_v28 = vmul.f32 %v2523_v27, %v2523_v27 }
 0xf14   : > { %v2525_v29 = vsel %vm1192_vm1, %v2524_v28, 0.0 }
 0xf15   : > { %2526 = vadd.xlane.f32.xlu1 %v2525_v29 }
 0xfa2   : > { %v2527_v26 = vpop.xlane.xlu1 %2526 }
 0xfa3   : > { %v2528_v34 = vmul.f32 0.03125, %v2527_v26 }
 0xfa5   : > { %v2529_v35 = vadd.f32 1e-05, %v2528_v34 }
 0xfa7   : > { %3782 = vrsqrt.f32 %v2529_v35 }
 0xfb1   : > { %v3783_v36 = vpop.eup %3782 }
 0xfb2   : > { %v2531_v38 = vmul.f32 %v3783_v36, %v2523_v27 }
 0xfb4   : > { %v2539_v40 = vmul.f32 %v3181_v37, %v2531_v38 }
 0xfb6   : > { %v2547_v41 = vadd.f32 %v3182_v39, %v2539_v40 }
 0xfb8   : > { %v2548_v42 = vpack.c.bf16 %v2547_v41, %v2547_v41 }
 0xfba   : > { %3407 = vmatmul.mubr.msk.bf16.vlgmr.msra.gmra.mrb[44].mxu0 %vm1192_vm1, %v2548_v42 }
0x108d   : > { %v2609_v46 = vpop.f32.mrb[44].mxu0 }
0x108e   : > { %v2610_v47 = vadd.f32 %v3183_v45, %v2609_v46  ;;  %v3408_v48 = vpop.f32.mrb[45].mxu0 }
0x108f   : > { %v2612_v49 = vpop.f32.mrb[46].mxu0 }
0x1090   : > { %v2615_v50 = vmax.f32 %v2610_v47, 0.0  ;;  %v3409_v51 = vpop.f32.mrb[47].mxu0 }
0x1092   : > { %v2616_v52 = vpack.c.bf16 %v2615_v50, %v2615_v50 }
0x1094   : > { %3419 = vmatmul.mubr.msk.bf16.vlgmr.msra.gmra.mrb[44].mxu1 %vm2656_vm6, %v2616_v52 }
0x1167   : > { %v2694_v54 = vpop.f32.mrb[44].mxu1 }
0x1168   : > { %v2695_v55 = vadd.f32 %v3187_v53, %v2694_v54  ;;  %v3420_v56 = vpop.f32.mrb[45].mxu1 }
0x1169   : > { %v2697_v57 = vpop.f32.mrb[46].mxu1 }
0x116a   : > { %v3421_v58 = vpop.f32.mrb[47].mxu1  ;;  %v2700_v59 = vadd.f32 %v2695_v55, %v2547_v41 }
0x116c   : > { %v2701_v0 = vsel %vm1192_vm1, %v2700_v59, 0.0 }
0x116d   : > { %2702 = vadd.xlane.f32.xlu0 %v2701_v0 }
0x11fa   : > { %v2703_v60 = vpop.xlane.xlu0 %2702 }
0x11fb   : > { %v2704_v61 = vmul.f32 0.03125, %v2703_v60 }
0x11fd   : > { %v2705_v62 = vsub.f32 %v2700_v59, %v2704_v61 }
0x11ff   : > { %v2706_v63 = vmul.f32 %v2705_v62, %v2705_v62 }
0x1201   : > { %v2707_v1 = vsel %vm1192_vm1, %v2706_v63, 0.0 }
0x1202   : > { %2708 = vadd.xlane.f32.xlu0 %v2707_v1 }
0x128f   : > { %v2709_v2 = vpop.xlane.xlu0 %2708 }
0x1290   : > { %v2710_v3 = vmul.f32 0.03125, %v2709_v2 }
0x1292   : > { %v2711_v4 = vadd.f32 1e-05, %v2710_v3 }
0x1294   : > { %3784 = vrsqrt.f32 %v2711_v4 }
0x129e   : > { %v3785_v5 = vpop.eup %3784 }
0x129f   : > { %v2713_v8 = vmul.f32 %v3785_v5, %v2705_v62 }
0x12a1   : > { %v2721_v10 = vmul.f32 %v3193_v7, %v2713_v8 }
0x12a3   : > { %v2729_v11 = vadd.f32 %v3194_v9, %v2721_v10 }
0x12a5   : > { %2730 = vst.msk [vmem:[%s1161_s9] sm:$0xff] %vm1192_vm1, %v2729_v11 }
0x12a6   : > { %4505 = shalt.err (!%p4502_p11)
}
0x12a7   : > { %s4506_s3 = scalar_lea.hbm %s5715_s4, 128  ;;  %s4510_s23 = scalar_lea.hbm %s5951_s14, 256 }
0x12a8   : > { %p4507_p13 = scmp.ne.s32.totalorder %s5715_s4, %s4506_s3  ;;  %p4511_p8 = scmp.lt.u32.totalorder %s5715_s4, %s5951_s14 }
0x12a9   : > { %p4512_p6 = scmp.lt.u32.totalorder %s4510_s23, %s4506_s3  ;;  %p4514_p2 = scmp.lt.u32.totalorder %s4506_s3, %s5715_s4 }
0x12aa   : > { %p4508_p4 = pnand %p4507_p13, %p5952_p1 }
0x12ab   : > { %p4513_p5 = por %p4512_p6, %p4511_p8 }
0x12ac   : > { %p4509_p7 = pneg %p4508_p4 }
0x12ad   : > { %p4515_p9 = por %p4514_p2, %p4513_p5 }
0x12af   : > { %p4516_p10 = pnand %p4515_p9, %p4509_p7 }
0x12b1   : > { %4519 = shalt.err (!%p4516_p10)
}
0x12b2   : > { %3516 = dma.vmem_to_hbm [thread:$0]  (%p5952_p1), %s5717_s10, 128, %s5715_s4, %s2732_s17  }
0x12b3 PF: > { %s5953_s15 = sld [smem:[#allocation58_spill]]  ;;  %s2758_s21 = sand.u32 1, %s4602_s29  }
0x12b4   : > { %p5954_p3 = scmp.ne.s32.totalorder %s5900_s5, 0  ;;  %s2759_s8 = scalar_lea.sflag [#allocation4], %s2758_s21 }
0x12b9   : > { %p5955_p0 = scmp.ge.s32.totalorder %s5953_s15, 2 }
0x12bb   : > { %p3596_p12 = pnand %p5955_p0, %p5954_p3 }
0x12bd   : > { %4597 = dma.done.wait (!%p3596_p12), %s2759_s8, 128  }
0x12be   : > { %4599 = vsyncadd (!%p3596_p12), %s2759_s8, 4294967168  ;;  %s55_s3 = sadd.s32 1, %s5953_s15   ;;  %s5956_s12 = sld [smem:[#allocation62_spill]] }
0x12bf   : > { %p52_p11 = scmp.ge.s32.totalorder %s55_s3, 4   ;;  %s5957_s30 = sld [smem:[#allocation57_spill]] }
0x12c0   : > { %s5958_s7 = sld [smem:[#allocation61_spill]]  ;;  %s5959_s29 = smov %s4606_s2 }
0x12c1   : > { %s5960_s2 = smov %s4610_s6  ;;  %54 = sbr.rel (!%p52_p11) target bundleno = 46 (0x2e), region = 277 }
0x12c4   : > { %s5961_s6 = smov %s5956_s12 }
0x12c8   :  { %2764 = vsyncpa [#allocation3], 1 }
0x12c9   :  { %2766 = vsyncpa [#allocation3 + $0x1], 1 }
0x12ca   :  { %2767 = vsyncpa [#allocation6], 1 }
0x12cb   :  { %2769 = vsyncpa [#allocation6 + $0x1], 1 }
0x12cc   :  { %2770 = vsyncpa [#allocation9], 1 }
0x12cd   :  { %2771 = vsyncpa [#allocation12], 1 }
0x12ce   :  { %2772 = vsyncpa [#allocation15], 1 }
0x12cf   :  { %2773 = vsyncpa [#allocation18], 1 }
0x12d0   :  { %2774 = vsyncpa [#allocation21], 1 }
0x12d1   :  { %2775 = vsyncpa [#allocation24], 1 }
0x12d2   :  { %2776 = vsyncpa [#allocation27], 1 }
0x12d3   :  { %2777 = vsyncpa [#allocation30], 1 }
0x12d4   :  { %2778 = vsyncpa [#allocation33], 1 }
0x12d5   :  { %2779 = vsyncpa [#allocation36], 1 }
0x12d6   :  { %2780 = vsyncpa [#allocation39], 1 }
0x12d7   :  { %2781 = vsyncpa [#allocation4], 1 }
0x12d8   :  { %2783 = vsyncpa [#allocation4 + $0x1], 1 }

</bundles_post_ra>
